<compile_context>
chip_gen: v7x
topology: tpu7x:2x2x1
jax: 0.10.0
libtpu: 0.0.40
codegen_flags: <defaults>
</compile_context>

<pallas_src>
import functools

import jax
import jax.numpy as jnp
import numpy as np
from jax.experimental import pallas as pl
from jax.experimental.pallas import tpu as pltpu


def _dbrx_moe_kernel(active_ref, x_ref, w1_ref, v1_ref, w2_ref, rw_ref,
                     o_ref, acc_ref):
    """One grid step: token tile `t`, expert `e`, intermediate tile `j`."""
    t = pl.program_id(0)
    e = pl.program_id(1)
    j = pl.program_id(2)

    @pl.when(jnp.logical_and(e == 0, j == 0))
    def _init():
        acc_ref[...] = jnp.zeros_like(acc_ref)

    @pl.when(active_ref[t, e] > 0)   # skip experts no token in this tile uses
    def _compute():
        x = x_ref[...]               # (tm, D), native dtype feeds the MXU
        # gate / up projections for this intermediate tile, f32 accumulation.
        gate = jnp.dot(x, w1_ref[0], preferred_element_type=jnp.float32)
        up = jnp.dot(x, v1_ref[0], preferred_element_type=jnp.float32)
        # routing weight of expert `e` for every token in the tile:
        # rw_ref is a lane-dense (tm, E) f32 block; select column e.
        rw = rw_ref[...]
        lane = jax.lax.broadcasted_iota(jnp.int32, rw.shape, 1)
        scale = jnp.sum(jnp.where(lane == e, rw, 0.0), axis=1, keepdims=True)
        # SiLU-and-mul (DBRX GLU) in f32, apply routing weight on the small
        # (tm, tn_i) tile, cast back to the MXU dtype for the down projection.
        h = gate * jax.nn.sigmoid(gate) * up
        h = (h * scale).astype(x.dtype)
        acc_ref[...] += jnp.dot(h, w2_ref[0],
                                preferred_element_type=jnp.float32)

    @pl.when(jnp.logical_and(e == pl.num_programs(1) - 1,
                             j == pl.num_programs(2) - 1))
    def _finalize():
        o_ref[...] = acc_ref[...].astype(o_ref.dtype)


def _round_up(x, m):
    return (x + m - 1) // m * m


def _pick_i_tile(inter, target=512):
    """Largest multiple-of-128 divisor of `inter` that is <= target."""
    if inter <= target:
        return inter
    for t in range(target, 127, -1):
        if t % 128 == 0 and inter % t == 0:
            return t
    return inter   # TODO(synk): pad awkward TP-shard sizes instead of full-I tiles


def prepare_dbrx_expert_weights(ws, w2s):
    """One-time (model-load-time) re-layout of the torch-convention weights.

    ws  : [E, 2I, D]  merged [w1; v1] (Linear out x in)
    w2s : [E, D, I]
    Returns row-major operands for the kernel's NN matmuls:
      w1_t [E, D, I], v1_t [E, D, I], w2_t [E, I, D].
    """
    _, two_i, _ = ws.shape
    inter = two_i // 2
    w1_t = jnp.transpose(ws[:, :inter, :], (0, 2, 1))
    v1_t = jnp.transpose(ws[:, inter:, :], (0, 2, 1))
    w2_t = jnp.transpose(w2s, (0, 2, 1))
    return w1_t, v1_t, w2_t


def _routing_weights(x, router_w, top_k):
    """Router -> softmax -> top-k -> renormalize, as a dense (T, E) f32 map."""
    # TODO(synk): top_k / scatter has no clean Pallas form; kept as JAX glue.
    T = x.shape[0]
    E = router_w.shape[0]
    logits = jnp.dot(x.astype(jnp.float32), router_w.T.astype(jnp.float32),
                     precision=jax.lax.Precision.HIGHEST)
    probs = jax.nn.softmax(logits, axis=-1)
    topk_w, topk_idx = jax.lax.top_k(probs, top_k)
    topk_w = topk_w / jnp.sum(topk_w, axis=-1, keepdims=True)
    dense = jnp.zeros((T, E), jnp.float32)
    dense = dense.at[jnp.arange(T)[:, None], topk_idx].set(topk_w)
    return dense


def dbrx_experts_forward(hidden_states, router_w, w1_t, v1_t, w2_t, top_k,
                         *, tm=None, tn_i=None):
    """hidden_states [B,S,D]; router_w [E,D]; w1_t/v1_t [E,D,I]; w2_t [E,I,D]."""
    B, S, D = hidden_states.shape
    E, _, inter = w1_t.shape
    x = hidden_states.reshape(-1, D)
    T = x.shape[0]

    dense_rw = _routing_weights(x, router_w, top_k)           # (T, E) f32

    # ---- tile selection ----
    if tm is None:
        tm = min(256, _round_up(T, 8))
    tm = max(8, _round_up(tm, 8))
    t_pad = _round_up(T, tm)
    n_t = t_pad // tm
    if tn_i is None:
        tn_i = _pick_i_tile(inter)
    assert inter % tn_i == 0
    n_i = inter // tn_i

    # Pad the token axis so every tile is full; padded rows carry zero routing
    # weight and therefore contribute nothing.
    if t_pad != T:
        x_p = jnp.pad(x, ((0, t_pad - T), (0, 0)))
        rw_p = jnp.pad(dense_rw, ((0, t_pad - T), (0, 0)))
    else:
        x_p, rw_p = x, dense_rw

    # per-(token-tile, expert) activity flags, scalar-prefetched into SMEM
    active = (rw_p.reshape(n_t, tm, E).max(axis=1) > 0.0).astype(jnp.int32)

    # ---- VMEM / cost bookkeeping ----
    x_bytes = jnp.dtype(x.dtype).itemsize
    w_bytes = jnp.dtype(w1_t.dtype).itemsize
    o_bytes = jnp.dtype(hidden_states.dtype).itemsize
    vmem_est = (2 * tm * D * x_bytes            # x tile (double-buffered)
                + 2 * 2 * D * tn_i * w_bytes    # w1 + v1 tiles
                + 2 * tn_i * D * w_bytes        # w2 tile
                + 2 * tm * E * 4                # routing weights
                + 2 * tm * D * o_bytes          # output tile
                + tm * D * 4)                   # f32 accumulator scratch
    vmem_limit = max(32 * 1024 * 1024, int(vmem_est * 3 // 2) + (1 << 20))

    cost = pl.CostEstimate(
        flops=6 * E * t_pad * D * inter,
        transcendentals=E * t_pad * inter,
        bytes_accessed=(t_pad * D * (x_bytes + o_bytes)
                        + n_t * E * 3 * D * inter * w_bytes
                        + t_pad * E * 4),
    )

    out_flat = pl.pallas_call(
        _dbrx_moe_kernel,
        out_shape=jax.ShapeDtypeStruct((t_pad, D), hidden_states.dtype),
        grid_spec=pltpu.PrefetchScalarGridSpec(
            num_scalar_prefetch=1,
            grid=(n_t, E, n_i),
            in_specs=[
                pl.BlockSpec((tm, D), lambda t, e, j, *_: (t, 0)),          # tokens
                pl.BlockSpec((1, D, tn_i), lambda t, e, j, *_: (e, 0, j)),  # w1[e]
                pl.BlockSpec((1, D, tn_i), lambda t, e, j, *_: (e, 0, j)),  # v1[e]
                pl.BlockSpec((1, tn_i, D), lambda t, e, j, *_: (e, j, 0)),  # w2[e]
                pl.BlockSpec((tm, E), lambda t, e, j, *_: (t, 0)),          # routing
            ],
            out_specs=pl.BlockSpec((tm, D), lambda t, e, j, *_: (t, 0)),
            scratch_shapes=[pltpu.VMEM((tm, D), jnp.float32)],
        ),
        compiler_params=pltpu.CompilerParams(
            dimension_semantics=("parallel", "arbitrary", "arbitrary"),
            vmem_limit_bytes=vmem_limit,
        ),
        cost_estimate=cost,
    )(active, x_p, w1_t, v1_t, w2_t, rw_p)

    # TODO(synk): tp_size > 1 all-reduce across ranks is not modeled here.
    return out_flat[:T].reshape(B, S, D)


def _reference(hidden_states, router_w, ws, w2s, top_k):
    """Pure-JAX reference with the same fused-MoE semantics (torch layouts)."""
    B, S, D = hidden_states.shape
    E, two_i, _ = ws.shape
    inter = two_i // 2
    x = hidden_states.reshape(-1, D).astype(jnp.float32)
    dense_rw = _routing_weights(x, router_w, top_k)
    hi = jax.lax.Precision.HIGHEST
    acc = jnp.zeros_like(x)
    for e in range(E):
        gate_up = jnp.dot(x, ws[e].T.astype(jnp.float32), precision=hi)
        gate, up = gate_up[:, :inter], gate_up[:, inter:]
        h = gate * jax.nn.sigmoid(gate) * up
        acc = acc + jnp.dot(h, w2s[e].T.astype(jnp.float32),
                            precision=hi) * dense_rw[:, e:e + 1]
    return acc.reshape(B, S, D).astype(hidden_states.dtype)


if __name__ == "__main__":
    # Small DBRX-like config (tp_size = 1):
    B, S = 2, 64               # batch, sequence  -> T = 128 tokens
    D = 256                    # d_model
    INTER = 512                # ffn_hidden_size (per-rank intermediate size)
    E = 4                      # moe_num_experts
    TOP_K = 2                  # moe_top_k
    dtype = jnp.float32

    key = jax.random.PRNGKey(0)
    k_x, k_r, k_ws, k_w2 = jax.random.split(key, 4)
    hidden_states = jax.random.normal(k_x, (B, S, D), dtype=dtype)
    router_w = jax.random.normal(k_r, (E, D), dtype=dtype) * 0.1
    ws = jax.random.normal(k_ws, (E, 2 * INTER, D), dtype=dtype) * 0.05   # [w1; v1]
    w2s = jax.random.normal(k_w2, (E, D, INTER), dtype=dtype) * 0.05

    # One-time (load-time) weight re-layout; not part of the per-call path.
    w1_t, v1_t, w2_t = prepare_dbrx_expert_weights(ws, w2s)

    # tm=64, tn_i=256 exercises a multi-tile grid: (2 token tiles, 4 experts,
    # 2 intermediate tiles).
    fwd = jax.jit(functools.partial(dbrx_experts_forward,
                                    top_k=TOP_K, tm=64, tn_i=256))
    out = fwd(hidden_states, router_w, w1_t, v1_t, w2_t)
    out = jax.block_until_ready(out)

    ref = _reference(hidden_states, router_w, ws, w2s, TOP_K)
    np.testing.assert_allclose(np.asarray(out, dtype=np.float32),
                               np.asarray(ref, dtype=np.float32),
                               rtol=2e-3, atol=2e-3)

    assert out.shape == (B, S, D) and out.dtype == hidden_states.dtype
    print("KERNEL_OK")
</pallas_src>

<mosaic_0001>
module attributes {stable_mosaic.version = 11 : i64} {
  func.func @_dbrx_moe_kernel(%arg0: i32, %arg1: i32, %arg2: i32, %arg3: memref<2x4xi32, #tpu.memory_space<smem>>, %arg4: memref<64x256xf32, #tpu.memory_space<vmem>>, %arg5: memref<1x256x256xf32, #tpu.memory_space<vmem>>, %arg6: memref<1x256x256xf32, #tpu.memory_space<vmem>>, %arg7: memref<1x256x256xf32, #tpu.memory_space<vmem>>, %arg8: memref<64x4xf32, #tpu.memory_space<vmem>>, %arg9: memref<64x256xf32, #tpu.memory_space<vmem>>, %arg10: memref<64x256xf32, #tpu.memory_space<vmem>>) attributes {dimension_semantics = [#tpu.dimension_semantics<parallel>, #tpu.dimension_semantics<arbitrary>, #tpu.dimension_semantics<arbitrary>], iteration_bounds = array<i64: 2, 4, 2>, scalar_prefetch = 1 : i64, scratch_operands = 1 : i64, tpu.core_type = #tpu.core_type<tc>, window_params = [{transform_indices = @transform_0, window_bounds = array<i64: 64, 256>}, {transform_indices = @transform_1, window_bounds = array<i64: 1, 256, 256>}, {transform_indices = @transform_2, window_bounds = array<i64: 1, 256, 256>}, {transform_indices = @transform_3, window_bounds = array<i64: 1, 256, 256>}, {transform_indices = @transform_4, window_bounds = array<i64: 64, 4>}, {transform_indices = @transform_5, window_bounds = array<i64: 64, 256>}]} {
    %c0_i32 = arith.constant 0 : i32
    %0 = arith.cmpi eq, %arg1, %c0_i32 : i32
    %c0_i32_0 = arith.constant 0 : i32
    %1 = arith.cmpi eq, %arg2, %c0_i32_0 : i32
    %2 = arith.andi %0, %1 : i1
    %3 = arith.extui %2 : i1 to i32
    %c0_i32_1 = arith.constant 0 : i32
    %4 = arith.cmpi ne, %3, %c0_i32_1 : i32
    scf.if %4 {
      %cst = arith.constant 0.000000e+00 : f32
      %16 = vector.broadcast %cst : f32 to vector<64x256xf32>
      %c0 = arith.constant 0 : index
      %c0_5 = arith.constant 0 : index
      %17 = vector.load %arg10[%c0, %c0_5] : memref<64x256xf32, #tpu.memory_space<vmem>>, vector<64x256xf32>
      tpu.vector_store %arg10[%c0, %c0_5], %16 {strides = array<i32>} : memref<64x256xf32, #tpu.memory_space<vmem>>, vector<64x256xf32>,
    } else {
    }
    %5 = arith.index_cast %arg0 : i32 to index
    %6 = arith.index_cast %arg1 : i32 to index
    %7 = memref.load %arg3[%5, %6] : memref<2x4xi32, #tpu.memory_space<smem>>
    %c0_i32_2 = arith.constant 0 : i32
    %8 = arith.cmpi sgt, %7, %c0_i32_2 : i32
    %9 = arith.extui %8 : i1 to i32
    %c0_i32_3 = arith.constant 0 : i32
    %10 = arith.cmpi ne, %9, %c0_i32_3 : i32
    scf.if %10 {
      %c0 = arith.constant 0 : index
      %c0_5 = arith.constant 0 : index
      %16 = vector.load %arg4[%c0, %c0_5] : memref<64x256xf32, #tpu.memory_space<vmem>>, vector<64x256xf32>
      %c0_6 = arith.constant 0 : index
      %c0_7 = arith.constant 0 : index
      %c0_8 = arith.constant 0 : index
      %17 = vector.load %arg5[%c0_6, %c0_7, %c0_8] : memref<1x256x256xf32, #tpu.memory_space<vmem>>, vector<1x256x256xf32>
      %18 = vector.shape_cast %17 : vector<1x256x256xf32> to vector<256x256xf32>
      %cst = arith.constant dense<0.000000e+00> : vector<64x256xf32>
      %19 = tpu.matmul %16, %18, %cst {dimension_numbers = #tpu.dot_dimension_numbers<[1], [0], [0], [1], [0, 0, 1, 1], [], []>} : vector<64x256xf32>, vector<256x256xf32>, vector<64x256xf32> -> vector<64x256xf32>
      %c0_9 = arith.constant 0 : index
      %c0_10 = arith.constant 0 : index
      %c0_11 = arith.constant 0 : index
      %20 = vector.load %arg6[%c0_9, %c0_10, %c0_11] : memref<1x256x256xf32, #tpu.memory_space<vmem>>, vector<1x256x256xf32>
      %21 = vector.shape_cast %20 : vector<1x256x256xf32> to vector<256x256xf32>
      %cst_12 = arith.constant dense<0.000000e+00> : vector<64x256xf32>
      %22 = tpu.matmul %16, %21, %cst_12 {dimension_numbers = #tpu.dot_dimension_numbers<[1], [0], [0], [1], [0, 0, 1, 1], [], []>} : vector<64x256xf32>, vector<256x256xf32>, vector<64x256xf32> -> vector<64x256xf32>
      %c0_13 = arith.constant 0 : index
      %c0_14 = arith.constant 0 : index
      %23 = vector.load %arg8[%c0_13, %c0_14] : memref<64x4xf32, #tpu.memory_space<vmem>>, vector<64x4xf32>
      %24 = tpu.iota {dimensions = array<i32: 1>} : vector<64x4xi32>
      %25 = vector.broadcast %arg1 : i32 to vector<64x4xi32>
      %26 = arith.cmpi eq, %24, %25 : vector<64x4xi32>
      %cst_15 = arith.constant 0.000000e+00 : f32
      %27 = vector.broadcast %cst_15 : f32 to vector<64x4xf32>
      %28 = arith.select %26, %23, %27 : vector<64x4xi1>, vector<64x4xf32>
      %cst_16 = arith.constant dense<0.000000e+00> : vector<64xf32>
      %29 = vector.multi_reduction <add>, %28, %cst_16 [1] : vector<64x4xf32> to vector<64xf32>
      %30 = vector.shape_cast %29 : vector<64xf32> to vector<64x1xf32>
      %31 = arith.negf %19 : vector<64x256xf32>
      %32 = math.exp %31 : vector<64x256xf32>
      %cst_17 = arith.constant 1.000000e+00 : f32
      %33 = vector.broadcast %cst_17 : f32 to vector<64x256xf32>
      %34 = arith.addf %33, %32 : vector<64x256xf32>
      %35 = arith.divf %33, %34 : vector<64x256xf32>
      %36 = arith.mulf %19, %35 : vector<64x256xf32>
      %37 = arith.mulf %36, %22 : vector<64x256xf32>
      %38 = vector.broadcast %30 : vector<64x1xf32> to vector<64x256xf32>
      %39 = arith.mulf %37, %38 : vector<64x256xf32>
      %c0_18 = arith.constant 0 : index
      %c0_19 = arith.constant 0 : index
      %40 = vector.load %arg10[%c0_18, %c0_19] : memref<64x256xf32, #tpu.memory_space<vmem>>, vector<64x256xf32>
      %c0_20 = arith.constant 0 : index
      %c0_21 = arith.constant 0 : index
      %c0_22 = arith.constant 0 : index
      %41 = vector.load %arg7[%c0_20, %c0_21, %c0_22] : memref<1x256x256xf32, #tpu.memory_space<vmem>>, vector<1x256x256xf32>
      %42 = vector.shape_cast %41 : vector<1x256x256xf32> to vector<256x256xf32>
      %cst_23 = arith.constant dense<0.000000e+00> : vector<64x256xf32>
      %43 = tpu.matmul %39, %42, %cst_23 {dimension_numbers = #tpu.dot_dimension_numbers<[1], [0], [0], [1], [0, 0, 1, 1], [], []>} : vector<64x256xf32>, vector<256x256xf32>, vector<64x256xf32> -> vector<64x256xf32>
      %44 = arith.addf %40, %43 : vector<64x256xf32>
      %c0_24 = arith.constant 0 : index
      %c0_25 = arith.constant 0 : index
      %45 = vector.load %arg10[%c0_24, %c0_25] : memref<64x256xf32, #tpu.memory_space<vmem>>, vector<64x256xf32>
      tpu.vector_store %arg10[%c0_24, %c0_25], %44 {strides = array<i32>} : memref<64x256xf32, #tpu.memory_space<vmem>>, vector<64x256xf32>,
    } else {
    }
    %c3_i32 = arith.constant 3 : i32
    %11 = arith.cmpi eq, %arg1, %c3_i32 : i32
    %c1_i32 = arith.constant 1 : i32
    %12 = arith.cmpi eq, %arg2, %c1_i32 : i32
    %13 = arith.andi %11, %12 : i1
    %14 = arith.extui %13 : i1 to i32
    %c0_i32_4 = arith.constant 0 : i32
    %15 = arith.cmpi ne, %14, %c0_i32_4 : i32
    scf.if %15 {
      %c0 = arith.constant 0 : index
      %c0_5 = arith.constant 0 : index
      %16 = vector.load %arg10[%c0, %c0_5] : memref<64x256xf32, #tpu.memory_space<vmem>>, vector<64x256xf32>
      %c0_6 = arith.constant 0 : index
      %c0_7 = arith.constant 0 : index
      %17 = vector.load %arg9[%c0_6, %c0_7] : memref<64x256xf32, #tpu.memory_space<vmem>>, vector<64x256xf32>
      tpu.vector_store %arg9[%c0_6, %c0_7], %16 {strides = array<i32>} : memref<64x256xf32, #tpu.memory_space<vmem>>, vector<64x256xf32>,
    } else {
    }
    return
  }
  func.func @transform_0(%arg0: i32, %arg1: i32, %arg2: i32, %arg3: memref<2x4xi32, #tpu.memory_space<smem>>) -> (i32, i32) {
    %c0_i32 = arith.constant 0 : i32
    %c0_i32_0 = arith.constant 0 : i32
    return %arg0, %c0_i32 : i32, i32
  }
  func.func @transform_1(%arg0: i32, %arg1: i32, %arg2: i32, %arg3: memref<2x4xi32, #tpu.memory_space<smem>>) -> (i32, i32, i32) {
    %c0_i32 = arith.constant 0 : i32
    %c0_i32_0 = arith.constant 0 : i32
    return %arg1, %c0_i32, %arg2 : i32, i32, i32
  }
  func.func @transform_2(%arg0: i32, %arg1: i32, %arg2: i32, %arg3: memref<2x4xi32, #tpu.memory_space<smem>>) -> (i32, i32, i32) {
    %c0_i32 = arith.constant 0 : i32
    %c0_i32_0 = arith.constant 0 : i32
    return %arg1, %c0_i32, %arg2 : i32, i32, i32
  }
  func.func @transform_3(%arg0: i32, %arg1: i32, %arg2: i32, %arg3: memref<2x4xi32, #tpu.memory_space<smem>>) -> (i32, i32, i32) {
    %c0_i32 = arith.constant 0 : i32
    %c0_i32_0 = arith.constant 0 : i32
    return %arg1, %arg2, %c0_i32 : i32, i32, i32
  }
  func.func @transform_4(%arg0: i32, %arg1: i32, %arg2: i32, %arg3: memref<2x4xi32, #tpu.memory_space<smem>>) -> (i32, i32) {
    %c0_i32 = arith.constant 0 : i32
    %c0_i32_0 = arith.constant 0 : i32
    return %arg0, %c0_i32 : i32, i32
  }
  func.func @transform_5(%arg0: i32, %arg1: i32, %arg2: i32, %arg3: memref<2x4xi32, #tpu.memory_space<smem>>) -> (i32, i32) {
    %c0_i32 = arith.constant 0 : i32
    %c0_i32_0 = arith.constant 0 : i32
    return %arg0, %c0_i32 : i32, i32
  }
}

</mosaic_0001>

<bundles_post_ra>
// kernel: dbrx_experts_forward.1
= control target key start
LH: loop header
LB: loop body
LE: loop exit
PB: predicated region body
PF: predicated region fallthrough
CT: control target
= control target key end

     0   :  { %s3186_s0 = inlined_call_operand.vmem [shape: s32[2,4], index: 0, kind: input, shape index: {}]   ;;  %s3187_s1 = inlined_call_operand.vmem [shape: f32[128,256], index: 1, kind: input, shape index: {}]   ;;  %s3188_s2 = inlined_call_operand.vmem [shape: f32[4,256,512], index: 2, kind: input, shape index: {}]   ;;  %s3189_s3 = inlined_call_operand.vmem [shape: f32[4,256,512], index: 3, kind: input, shape index: {}]   ;;  %s3190_s4 = inlined_call_operand.vmem [shape: f32[4,512,256], index: 4, kind: input, shape index: {}]   ;;  %s3191_s5 = inlined_call_operand.vmem [shape: f32[128,4], index: 5, kind: input, shape index: {}]   ;;  %s3192_s6 = inlined_call_operand.hbm [shape: f32[128,256], index: 6, kind: output, shape index: {}]  }
   0x1   :  { %3202 = sst [smem:[#allocation20_spill]] %s3188_s2  ;;  %s11_s23 = sshll.u32 %s3186_s0, 4  ;;  %s12_s23 = int_to_ptr.vmem [resolvable:$true] %s11_s23 }
   0x2   :  { %3203 = sst [smem:[#allocation21_spill]] %s3189_s3  ;;  %s2130_s24 = scalar_lea.vmem %s12_s23, 32 }
   0x3   :  { %3204 = sst [smem:[#allocation22_spill]] %s3192_s6  ;;  %p2131_p0 = scmp.ne.s32.totalorder %s12_s23, %s2130_s24 }
   0x4   :  { %p2135_p1 = scmp.lt.s32.totalorder %s12_s23, %s12_s23  ;;  %p2136_p2 = scmp.lt.s32.totalorder %s2130_s24, %s2130_s24 }
   0x6   :  { %p2137_p3 = por %p2136_p2, %p2135_p1 }
   0x8   :  { %p2138_p4 = pnand %p2137_p3, %p2131_p0 }
   0xa   :  { %2141 = shalt.err (!%p2138_p4)  }
   0xb   :  { %s2272_s25 = smov [#allocation4]  }
   0xc   :  { %14 = dma.vmem_to_smem %s12_s23, 32, %s2272_s25, [#allocation3] }
   0xd   :  { %2218 = dma.done.wait [#allocation3], 32 }
   0xe   :  { %2219 = vsyncadd [#allocation3], 4294967264 }
   0xf   :  { %16 = sfence }
  0x10   :  { %17 = vsyncpa [#allocation8], 0 }
  0x11   :  { %19 = vsyncpa [#allocation8 + $0x1], 0  ;;  %s2315_s26 = smov 0   ;;  %s2317_s27 = smov 0  }
  0x12   :  { %s2319_s0 = smov 0   ;;  %s2321_s28 = smov 0  }
  0x13   :  { %s2323_s29 = smov 0   ;;  %s2325_s30 = smov 0  }
  0x14   :  { %s2327_s7 = smov 0   ;;  %s2329_s8 = smov 0  }
  0x15   :  { %s2331_s9 = smov 0   ;;  %s2333_s10 = smov 0  }
  0x16   :  { %s2335_s11 = smov 0   ;;  %s2337_s12 = smov 0  }
  0x17 LB: > { %3205 = sst [smem:[#allocation11_spill]] %s2242_s29  ;;  %s1683_s13 = sadd.s32 4294967295, %s2270_s12   ;;  %s2270_s12 = sphi %s2337_s12, %s25_s12   ;;  %s2266_s11 = sphi %s2335_s11, %s3231_s11   ;;  %s2262_s10 = sphi %s2333_s10, %s3230_s10   ;;  %s2258_s9 = sphi %s2331_s9, %s3229_s9   ;;  %s2254_s8 = sphi %s2329_s8, %s3228_s8   ;;  %s2250_s7 = sphi %s2327_s7, %s3227_s7   ;;  %s2246_s30 = sphi %s2325_s30, %s3226_s30   ;;  %s2242_s29 = sphi %s2323_s29, %s3225_s29   ;;  %s2238_s28 = sphi %s2321_s28, %s3224_s28   ;;  %s2234_s0 = sphi %s2319_s0, %s3234_s0   ;;  %s2230_s27 = sphi %s2317_s27, %s3233_s27   ;;  %s2226_s26 = sphi %s2315_s26, %s3232_s26  }
  0x18   : > { %3206 = sst [smem:[#allocation12_spill]] %s2258_s9  ;;  %s1684_s14 = sadd.s32 4294967294, %s2270_s12  }
  0x19   : > { %3207 = sst [smem:[#allocation13_spill]] %s2262_s10  ;;  %s37_s15 = sadd.s32 1, %s2258_s9 }
  0x1a   : > { %3208 = sst [smem:[#allocation14_spill]] %s2266_s11  ;;  %s40_s16 = sadd.s32 1, %s2262_s10 }
  0x1b   : > { %p38_p5 = scmp.ge.s32.totalorder %s37_s15, 2  ;;  %s44_s17 = sadd.s32 1, %s2266_s11 }
  0x1c   : > { %s79_s18 = sadd.s32 1, %s2242_s29  ;;  %p86_p6 = scmp.ne.s32.totalorder %s2242_s29, %s2238_s28 }
  0x1d   : > { %s3236_s15 = smov (%p38_p5, %s37_s15), 0  ;;  %s3238_s16 = smov (!%p38_p5, %s40_s16), %s2262_s10 }
  0x1e   : > { %3209 = sst [smem:[#allocation15_spill]] %s3236_s15  ;;  %s75_s19 = ssub.s32 %s2258_s9, %s3236_s15 }
  0x1f   : > { %p87_p7 = scmp.eq.s32.totalorder %s2270_s12, 0  ;;  %p42_p8 = scmp.ge.s32.totalorder %s3238_s16, 4 }
  0x20   : > { %s187_s20 = sadd.s32 1, %s2234_s0  ;;  %p197_p10 = scmp.ne.s32.totalorder %s2234_s0, %s2230_s27 }
  0x21   : > { %p2390_p9 = por %p87_p7, %p86_p6  ;;  %s3240_s16 = smov (%p42_p8, %s3238_s16), 0 }
  0x22   : > { %3211 = sst [smem:[#allocation16_spill]] %s3240_s16  ;;  %s3242_s17 = smov (!%p42_p8, %s44_s17), %s2266_s11 }
  0x23   : > { %s74_s22 = ssub.s32 %s2262_s10, %s3240_s16  ;;  %p198_p11 = scmp.eq.s32.totalorder %s1683_s13, 15 }
  0x24   : > { %p46_p12 = scmp.ge.s32.totalorder %s3242_s17, 2  ;;  %s76_s23 = sor.u32 %s75_s19, %s74_s22 }
  0x25   : > { %p77_p13 = scmp.eq.s32.totalorder %s76_s23, 0  ;;  %p2401_p0 = por %p198_p11, %p197_p10 }
  0x26   : > { %s3244_s17 = smov (%p46_p12, %s3242_s17), 0  ;;  %p203_p1 = scmp.ne.s32.totalorder %s2230_s27, %s2226_s26 }
  0x27   : > { %3213 = sst [smem:[#allocation17_spill]] %s3244_s17  ;;  %s184_s15 = ssub.s32 %s2266_s11, %s3244_s17 }
  0x28   : > { %s2408_s25 = scalar_select %p77_p13, %s2242_s29, %s79_s18  }
  0x29   : > { %p185_p2 = scmp.eq.s32.totalorder %s184_s15, 0  ;;  %p204_p3 = scmp.eq.s32.totalorder %s1684_s14, 15 }
  0x2a   : > { %3214 = sst [smem:[#allocation18_spill]] %s2408_s25  ;;  %p1686_p5 = scmp.ge.s32.totalorder %s2270_s12, 16 }
  0x2b   : > { %s2415_s6 = scalar_select %p185_p2, %s2234_s0, %s187_s20  }
  0x2c   : > { %p2417_p4 = por %p204_p3, %p203_p1  ;;  %220 = sbr.rel (%p1686_p5) target bundleno = 135 (0x87), region = 16 }
  0x2d   : > { %3215 = sst [smem:[#allocation19_spill]] %s2415_s6 }
  0x33   : > { %233 = sbr.rel (!%p2390_p9) target bundleno = 93 (0x5d), region = 24  ;;  %s235_s18 = sand.u32 (%p2390_p9), 1, %s2242_s29  }
  0x34   : > { %s1688_s19 = sshll.u32 (%p2390_p9), %s2258_s9, 1  ;;  %s1687_s22 = sshll.u32 (%p2390_p9), %s235_s18, 9 }
  0x35   : > { %s1689_s15 = sshll.u32 (%p2390_p9), %s2262_s10, 7  ;;  %s3217_s2 = sld [smem:[#allocation20_spill]] (%p2390_p9) }
  0x36   : > { %s240_s14 = sadd.s32 (%p2390_p9), %s1689_s15, %s1688_s19  ;;  %s2435_s18 = scalar_lea.vmem (%p2390_p9), [#allocation5], %s1687_s22 }
  0x37   : > { %s1690_s20 = sshll.u32 (%p2390_p9), %s240_s14, 3 }
  0x3b   : > { %s2430_s16 = scalar_lea.vmem %s3217_s2, %s1690_s20 }
  0x3c   : > { %v255_v0 = vld [vmem:[%s2430_s16] sm:$0xff]  ;;  %v257_v1 = vld [vmem:[%s2430_s16 + $0x8] sm:$0xff] }
  0x3d   : > { %v259_v2 = vld [vmem:[%s2430_s16 + $0x20] sm:$0xff]  ;;  %256 = vst [vmem:[%s2435_s18] sm:$0xff] %v255_v0  ;;  %258 = vst [vmem:[%s2435_s18 + $0x8] sm:$0xff] %v257_v1  ;;  %v261_v3 = vld [vmem:[%s2430_s16 + $0x28] sm:$0xff] }
  0x3e   : > { %260 = vst [vmem:[%s2435_s18 + $0x10] sm:$0xff] %v259_v2  ;;  %v263_v4 = vld [vmem:[%s2430_s16 + $0x40] sm:$0xff]  ;;  %v265_v5 = vld [vmem:[%s2430_s16 + $0x48] sm:$0xff]  ;;  %262 = vst [vmem:[%s2435_s18 + $0x18] sm:$0xff] %v261_v3 }
  0x3f   : > { %264 = vst [vmem:[%s2435_s18 + $0x20] sm:$0xff] %v263_v4  ;;  %266 = vst [vmem:[%s2435_s18 + $0x28] sm:$0xff] %v265_v5  ;;  %v267_v6 = vld [vmem:[%s2430_s16 + $0x60] sm:$0xff]  ;;  %v269_v7 = vld [vmem:[%s2430_s16 + $0x68] sm:$0xff] }
  0x40   : > { %v271_v8 = vld [vmem:[%s2430_s16 + $0x80] sm:$0xff]  ;;  %268 = vst [vmem:[%s2435_s18 + $0x30] sm:$0xff] %v267_v6  ;;  %270 = vst [vmem:[%s2435_s18 + $0x38] sm:$0xff] %v269_v7  ;;  %v273_v9 = vld [vmem:[%s2430_s16 + $0x88] sm:$0xff] }
  0x41   : > { %272 = vst [vmem:[%s2435_s18 + $0x40] sm:$0xff] %v271_v8  ;;  %v275_v10 = vld [vmem:[%s2430_s16 + $0xa0] sm:$0xff]  ;;  %v277_v11 = vld [vmem:[%s2430_s16 + $0xa8] sm:$0xff]  ;;  %274 = vst [vmem:[%s2435_s18 + $0x48] sm:$0xff] %v273_v9 }
  0x42   : > { %276 = vst [vmem:[%s2435_s18 + $0x50] sm:$0xff] %v275_v10  ;;  %278 = vst [vmem:[%s2435_s18 + $0x58] sm:$0xff] %v277_v11  ;;  %v279_v12 = vld [vmem:[%s2430_s16 + $0xc0] sm:$0xff]  ;;  %v281_v13 = vld [vmem:[%s2430_s16 + $0xc8] sm:$0xff] }
  0x43   : > { %v283_v14 = vld [vmem:[%s2430_s16 + $0xe0] sm:$0xff]  ;;  %280 = vst [vmem:[%s2435_s18 + $0x60] sm:$0xff] %v279_v12  ;;  %282 = vst [vmem:[%s2435_s18 + $0x68] sm:$0xff] %v281_v13  ;;  %v285_v15 = vld [vmem:[%s2430_s16 + $0xe8] sm:$0xff] }
  0x44   : > { %284 = vst [vmem:[%s2435_s18 + $0x70] sm:$0xff] %v283_v14  ;;  %v287_v16 = vld [vmem:[%s2430_s16 + $0x100] sm:$0xff]  ;;  %v289_v17 = vld [vmem:[%s2430_s16 + $0x108] sm:$0xff]  ;;  %286 = vst [vmem:[%s2435_s18 + $0x78] sm:$0xff] %v285_v15 }
  0x45   : > { %288 = vst [vmem:[%s2435_s18 + $0x80] sm:$0xff] %v287_v16  ;;  %290 = vst [vmem:[%s2435_s18 + $0x88] sm:$0xff] %v289_v17  ;;  %v291_v18 = vld [vmem:[%s2430_s16 + $0x120] sm:$0xff]  ;;  %v293_v19 = vld [vmem:[%s2430_s16 + $0x128] sm:$0xff] }
  0x46   : > { %v295_v20 = vld [vmem:[%s2430_s16 + $0x140] sm:$0xff]  ;;  %292 = vst [vmem:[%s2435_s18 + $0x90] sm:$0xff] %v291_v18  ;;  %294 = vst [vmem:[%s2435_s18 + $0x98] sm:$0xff] %v293_v19  ;;  %v297_v21 = vld [vmem:[%s2430_s16 + $0x148] sm:$0xff] }
  0x47   : > { %296 = vst [vmem:[%s2435_s18 + $0xa0] sm:$0xff] %v295_v20  ;;  %v299_v22 = vld [vmem:[%s2430_s16 + $0x160] sm:$0xff]  ;;  %v301_v23 = vld [vmem:[%s2430_s16 + $0x168] sm:$0xff]  ;;  %298 = vst [vmem:[%s2435_s18 + $0xa8] sm:$0xff] %v297_v21 }
  0x48   : > { %300 = vst [vmem:[%s2435_s18 + $0xb0] sm:$0xff] %v299_v22  ;;  %302 = vst [vmem:[%s2435_s18 + $0xb8] sm:$0xff] %v301_v23  ;;  %v303_v24 = vld [vmem:[%s2430_s16 + $0x180] sm:$0xff]  ;;  %v305_v25 = vld [vmem:[%s2430_s16 + $0x188] sm:$0xff] }
  0x49   : > { %v307_v26 = vld [vmem:[%s2430_s16 + $0x1a0] sm:$0xff]  ;;  %304 = vst [vmem:[%s2435_s18 + $0xc0] sm:$0xff] %v303_v24  ;;  %306 = vst [vmem:[%s2435_s18 + $0xc8] sm:$0xff] %v305_v25  ;;  %v309_v27 = vld [vmem:[%s2430_s16 + $0x1a8] sm:$0xff] }
  0x4a   : > { %308 = vst [vmem:[%s2435_s18 + $0xd0] sm:$0xff] %v307_v26  ;;  %v311_v28 = vld [vmem:[%s2430_s16 + $0x1c0] sm:$0xff]  ;;  %v313_v29 = vld [vmem:[%s2430_s16 + $0x1c8] sm:$0xff]  ;;  %310 = vst [vmem:[%s2435_s18 + $0xd8] sm:$0xff] %v309_v27 }
  0x4b   : > { %312 = vst [vmem:[%s2435_s18 + $0xe0] sm:$0xff] %v311_v28  ;;  %314 = vst [vmem:[%s2435_s18 + $0xe8] sm:$0xff] %v313_v29  ;;  %v315_v30 = vld [vmem:[%s2430_s16 + $0x1e0] sm:$0xff]  ;;  %v317_v31 = vld [vmem:[%s2430_s16 + $0x1e8] sm:$0xff] }
  0x4c   : > { %v319_v32 = vld [vmem:[%s2430_s16 + $0x200] sm:$0xff]  ;;  %316 = vst [vmem:[%s2435_s18 + $0xf0] sm:$0xff] %v315_v30  ;;  %318 = vst [vmem:[%s2435_s18 + $0xf8] sm:$0xff] %v317_v31  ;;  %v321_v33 = vld [vmem:[%s2430_s16 + $0x208] sm:$0xff] }
  0x4d   : > { %320 = vst [vmem:[%s2435_s18 + $0x100] sm:$0xff] %v319_v32  ;;  %v323_v34 = vld [vmem:[%s2430_s16 + $0x220] sm:$0xff]  ;;  %v325_v35 = vld [vmem:[%s2430_s16 + $0x228] sm:$0xff]  ;;  %322 = vst [vmem:[%s2435_s18 + $0x108] sm:$0xff] %v321_v33 }
  0x4e   : > { %324 = vst [vmem:[%s2435_s18 + $0x110] sm:$0xff] %v323_v34  ;;  %326 = vst [vmem:[%s2435_s18 + $0x118] sm:$0xff] %v325_v35  ;;  %v327_v36 = vld [vmem:[%s2430_s16 + $0x240] sm:$0xff]  ;;  %v329_v37 = vld [vmem:[%s2430_s16 + $0x248] sm:$0xff] }
  0x4f   : > { %v331_v38 = vld [vmem:[%s2430_s16 + $0x260] sm:$0xff]  ;;  %328 = vst [vmem:[%s2435_s18 + $0x120] sm:$0xff] %v327_v36  ;;  %330 = vst [vmem:[%s2435_s18 + $0x128] sm:$0xff] %v329_v37  ;;  %v333_v39 = vld [vmem:[%s2430_s16 + $0x268] sm:$0xff] }
  0x50   : > { %332 = vst [vmem:[%s2435_s18 + $0x130] sm:$0xff] %v331_v38  ;;  %v335_v40 = vld [vmem:[%s2430_s16 + $0x280] sm:$0xff]  ;;  %v337_v41 = vld [vmem:[%s2430_s16 + $0x288] sm:$0xff]  ;;  %334 = vst [vmem:[%s2435_s18 + $0x138] sm:$0xff] %v333_v39 }
  0x51   : > { %336 = vst [vmem:[%s2435_s18 + $0x140] sm:$0xff] %v335_v40  ;;  %338 = vst [vmem:[%s2435_s18 + $0x148] sm:$0xff] %v337_v41  ;;  %v339_v42 = vld [vmem:[%s2430_s16 + $0x2a0] sm:$0xff]  ;;  %v341_v43 = vld [vmem:[%s2430_s16 + $0x2a8] sm:$0xff] }
  0x52   : > { %v343_v44 = vld [vmem:[%s2430_s16 + $0x2c0] sm:$0xff]  ;;  %340 = vst [vmem:[%s2435_s18 + $0x150] sm:$0xff] %v339_v42  ;;  %342 = vst [vmem:[%s2435_s18 + $0x158] sm:$0xff] %v341_v43  ;;  %v345_v45 = vld [vmem:[%s2430_s16 + $0x2c8] sm:$0xff] }
  0x53   : > { %344 = vst [vmem:[%s2435_s18 + $0x160] sm:$0xff] %v343_v44  ;;  %v347_v46 = vld [vmem:[%s2430_s16 + $0x2e0] sm:$0xff]  ;;  %v349_v47 = vld [vmem:[%s2430_s16 + $0x2e8] sm:$0xff]  ;;  %346 = vst [vmem:[%s2435_s18 + $0x168] sm:$0xff] %v345_v45 }
  0x54   : > { %348 = vst [vmem:[%s2435_s18 + $0x170] sm:$0xff] %v347_v46  ;;  %350 = vst [vmem:[%s2435_s18 + $0x178] sm:$0xff] %v349_v47  ;;  %v351_v48 = vld [vmem:[%s2430_s16 + $0x300] sm:$0xff]  ;;  %v353_v49 = vld [vmem:[%s2430_s16 + $0x308] sm:$0xff] }
  0x55   : > { %v355_v50 = vld [vmem:[%s2430_s16 + $0x320] sm:$0xff]  ;;  %352 = vst [vmem:[%s2435_s18 + $0x180] sm:$0xff] %v351_v48  ;;  %354 = vst [vmem:[%s2435_s18 + $0x188] sm:$0xff] %v353_v49  ;;  %v357_v51 = vld [vmem:[%s2430_s16 + $0x328] sm:$0xff] }
  0x56   : > { %356 = vst [vmem:[%s2435_s18 + $0x190] sm:$0xff] %v355_v50  ;;  %v359_v52 = vld [vmem:[%s2430_s16 + $0x340] sm:$0xff]  ;;  %v361_v53 = vld [vmem:[%s2430_s16 + $0x348] sm:$0xff]  ;;  %358 = vst [vmem:[%s2435_s18 + $0x198] sm:$0xff] %v357_v51 }
  0x57   : > { %360 = vst [vmem:[%s2435_s18 + $0x1a0] sm:$0xff] %v359_v52  ;;  %362 = vst [vmem:[%s2435_s18 + $0x1a8] sm:$0xff] %v361_v53  ;;  %v363_v54 = vld [vmem:[%s2430_s16 + $0x360] sm:$0xff]  ;;  %v365_v55 = vld [vmem:[%s2430_s16 + $0x368] sm:$0xff] }
  0x58   : > { %v367_v56 = vld [vmem:[%s2430_s16 + $0x380] sm:$0xff]  ;;  %364 = vst [vmem:[%s2435_s18 + $0x1b0] sm:$0xff] %v363_v54  ;;  %366 = vst [vmem:[%s2435_s18 + $0x1b8] sm:$0xff] %v365_v55  ;;  %v369_v57 = vld [vmem:[%s2430_s16 + $0x388] sm:$0xff] }
  0x59   : > { %368 = vst [vmem:[%s2435_s18 + $0x1c0] sm:$0xff] %v367_v56  ;;  %v371_v58 = vld [vmem:[%s2430_s16 + $0x3a0] sm:$0xff]  ;;  %v373_v59 = vld [vmem:[%s2430_s16 + $0x3a8] sm:$0xff]  ;;  %370 = vst [vmem:[%s2435_s18 + $0x1c8] sm:$0xff] %v369_v57 }
  0x5a   : > { %372 = vst [vmem:[%s2435_s18 + $0x1d0] sm:$0xff] %v371_v58  ;;  %374 = vst [vmem:[%s2435_s18 + $0x1d8] sm:$0xff] %v373_v59  ;;  %v375_v60 = vld [vmem:[%s2430_s16 + $0x3c0] sm:$0xff]  ;;  %v377_v61 = vld [vmem:[%s2430_s16 + $0x3c8] sm:$0xff] }
  0x5b   : > { %v379_v62 = vld [vmem:[%s2430_s16 + $0x3e0] sm:$0xff]  ;;  %376 = vst [vmem:[%s2435_s18 + $0x1e0] sm:$0xff] %v375_v60  ;;  %378 = vst [vmem:[%s2435_s18 + $0x1e8] sm:$0xff] %v377_v61  ;;  %v381_v63 = vld [vmem:[%s2430_s16 + $0x3e8] sm:$0xff] }
  0x5c   : > { %380 = vst [vmem:[%s2435_s18 + $0x1f0] sm:$0xff] %v379_v62  ;;  %382 = vst [vmem:[%s2435_s18 + $0x1f8] sm:$0xff] %v381_v63 }
  0x5d PF: > { %388 = sbr.rel (!%p2390_p9) target bundleno = 135 (0x87), region = 47  ;;  %s390_s17 = sand.u32 (%p2390_p9), 1, %s2242_s29  }
  0x5e   : > { %s1692_s19 = sshll.u32 (%p2390_p9), %s2258_s9, 1  ;;  %s1691_s22 = sshll.u32 (%p2390_p9), %s390_s17, 9 }
  0x5f   : > { %s1693_s15 = sshll.u32 (%p2390_p9), %s2262_s10, 7  ;;  %s3218_s3 = sld [smem:[#allocation21_spill]] (%p2390_p9) }
  0x60   : > { %s395_s14 = sadd.s32 (%p2390_p9), %s1693_s15, %s1692_s19  ;;  %s2575_s16 = scalar_lea.vmem (%p2390_p9), [#allocation6], %s1691_s22 }
  0x61   : > { %s1694_s20 = sshll.u32 (%p2390_p9), %s395_s14, 3 }
  0x65   : > { %s2570_s11 = scalar_lea.vmem %s3218_s3, %s1694_s20 }
  0x66   : > { %v410_v0 = vld [vmem:[%s2570_s11] sm:$0xff]  ;;  %v412_v1 = vld [vmem:[%s2570_s11 + $0x8] sm:$0xff] }
  0x67   : > { %v414_v2 = vld [vmem:[%s2570_s11 + $0x20] sm:$0xff]  ;;  %411 = vst [vmem:[%s2575_s16] sm:$0xff] %v410_v0  ;;  %413 = vst [vmem:[%s2575_s16 + $0x8] sm:$0xff] %v412_v1  ;;  %v416_v3 = vld [vmem:[%s2570_s11 + $0x28] sm:$0xff] }
  0x68   : > { %415 = vst [vmem:[%s2575_s16 + $0x10] sm:$0xff] %v414_v2  ;;  %v418_v4 = vld [vmem:[%s2570_s11 + $0x40] sm:$0xff]  ;;  %v420_v5 = vld [vmem:[%s2570_s11 + $0x48] sm:$0xff]  ;;  %417 = vst [vmem:[%s2575_s16 + $0x18] sm:$0xff] %v416_v3 }
  0x69   : > { %419 = vst [vmem:[%s2575_s16 + $0x20] sm:$0xff] %v418_v4  ;;  %421 = vst [vmem:[%s2575_s16 + $0x28] sm:$0xff] %v420_v5  ;;  %v422_v6 = vld [vmem:[%s2570_s11 + $0x60] sm:$0xff]  ;;  %v424_v7 = vld [vmem:[%s2570_s11 + $0x68] sm:$0xff] }
  0x6a   : > { %v426_v8 = vld [vmem:[%s2570_s11 + $0x80] sm:$0xff]  ;;  %423 = vst [vmem:[%s2575_s16 + $0x30] sm:$0xff] %v422_v6  ;;  %425 = vst [vmem:[%s2575_s16 + $0x38] sm:$0xff] %v424_v7  ;;  %v428_v9 = vld [vmem:[%s2570_s11 + $0x88] sm:$0xff] }
  0x6b   : > { %427 = vst [vmem:[%s2575_s16 + $0x40] sm:$0xff] %v426_v8  ;;  %v430_v10 = vld [vmem:[%s2570_s11 + $0xa0] sm:$0xff]  ;;  %v432_v11 = vld [vmem:[%s2570_s11 + $0xa8] sm:$0xff]  ;;  %429 = vst [vmem:[%s2575_s16 + $0x48] sm:$0xff] %v428_v9 }
  0x6c   : > { %431 = vst [vmem:[%s2575_s16 + $0x50] sm:$0xff] %v430_v10  ;;  %433 = vst [vmem:[%s2575_s16 + $0x58] sm:$0xff] %v432_v11  ;;  %v434_v12 = vld [vmem:[%s2570_s11 + $0xc0] sm:$0xff]  ;;  %v436_v13 = vld [vmem:[%s2570_s11 + $0xc8] sm:$0xff] }
  0x6d   : > { %v438_v14 = vld [vmem:[%s2570_s11 + $0xe0] sm:$0xff]  ;;  %435 = vst [vmem:[%s2575_s16 + $0x60] sm:$0xff] %v434_v12  ;;  %437 = vst [vmem:[%s2575_s16 + $0x68] sm:$0xff] %v436_v13  ;;  %v440_v15 = vld [vmem:[%s2570_s11 + $0xe8] sm:$0xff] }
  0x6e   : > { %439 = vst [vmem:[%s2575_s16 + $0x70] sm:$0xff] %v438_v14  ;;  %v442_v16 = vld [vmem:[%s2570_s11 + $0x100] sm:$0xff]  ;;  %v444_v17 = vld [vmem:[%s2570_s11 + $0x108] sm:$0xff]  ;;  %441 = vst [vmem:[%s2575_s16 + $0x78] sm:$0xff] %v440_v15 }
  0x6f   : > { %443 = vst [vmem:[%s2575_s16 + $0x80] sm:$0xff] %v442_v16  ;;  %445 = vst [vmem:[%s2575_s16 + $0x88] sm:$0xff] %v444_v17  ;;  %v446_v18 = vld [vmem:[%s2570_s11 + $0x120] sm:$0xff]  ;;  %v448_v19 = vld [vmem:[%s2570_s11 + $0x128] sm:$0xff] }
  0x70   : > { %v450_v20 = vld [vmem:[%s2570_s11 + $0x140] sm:$0xff]  ;;  %447 = vst [vmem:[%s2575_s16 + $0x90] sm:$0xff] %v446_v18  ;;  %449 = vst [vmem:[%s2575_s16 + $0x98] sm:$0xff] %v448_v19  ;;  %v452_v21 = vld [vmem:[%s2570_s11 + $0x148] sm:$0xff] }
  0x71   : > { %451 = vst [vmem:[%s2575_s16 + $0xa0] sm:$0xff] %v450_v20  ;;  %v454_v22 = vld [vmem:[%s2570_s11 + $0x160] sm:$0xff]  ;;  %v456_v23 = vld [vmem:[%s2570_s11 + $0x168] sm:$0xff]  ;;  %453 = vst [vmem:[%s2575_s16 + $0xa8] sm:$0xff] %v452_v21 }
  0x72   : > { %455 = vst [vmem:[%s2575_s16 + $0xb0] sm:$0xff] %v454_v22  ;;  %457 = vst [vmem:[%s2575_s16 + $0xb8] sm:$0xff] %v456_v23  ;;  %v458_v24 = vld [vmem:[%s2570_s11 + $0x180] sm:$0xff]  ;;  %v460_v25 = vld [vmem:[%s2570_s11 + $0x188] sm:$0xff] }
  0x73   : > { %v462_v26 = vld [vmem:[%s2570_s11 + $0x1a0] sm:$0xff]  ;;  %459 = vst [vmem:[%s2575_s16 + $0xc0] sm:$0xff] %v458_v24  ;;  %461 = vst [vmem:[%s2575_s16 + $0xc8] sm:$0xff] %v460_v25  ;;  %v464_v27 = vld [vmem:[%s2570_s11 + $0x1a8] sm:$0xff] }
  0x74   : > { %463 = vst [vmem:[%s2575_s16 + $0xd0] sm:$0xff] %v462_v26  ;;  %v466_v28 = vld [vmem:[%s2570_s11 + $0x1c0] sm:$0xff]  ;;  %v468_v29 = vld [vmem:[%s2570_s11 + $0x1c8] sm:$0xff]  ;;  %465 = vst [vmem:[%s2575_s16 + $0xd8] sm:$0xff] %v464_v27 }
  0x75   : > { %467 = vst [vmem:[%s2575_s16 + $0xe0] sm:$0xff] %v466_v28  ;;  %469 = vst [vmem:[%s2575_s16 + $0xe8] sm:$0xff] %v468_v29  ;;  %v470_v30 = vld [vmem:[%s2570_s11 + $0x1e0] sm:$0xff]  ;;  %v472_v31 = vld [vmem:[%s2570_s11 + $0x1e8] sm:$0xff] }
  0x76   : > { %v474_v32 = vld [vmem:[%s2570_s11 + $0x200] sm:$0xff]  ;;  %471 = vst [vmem:[%s2575_s16 + $0xf0] sm:$0xff] %v470_v30  ;;  %473 = vst [vmem:[%s2575_s16 + $0xf8] sm:$0xff] %v472_v31  ;;  %v476_v33 = vld [vmem:[%s2570_s11 + $0x208] sm:$0xff] }
  0x77   : > { %475 = vst [vmem:[%s2575_s16 + $0x100] sm:$0xff] %v474_v32  ;;  %v478_v34 = vld [vmem:[%s2570_s11 + $0x220] sm:$0xff]  ;;  %v480_v35 = vld [vmem:[%s2570_s11 + $0x228] sm:$0xff]  ;;  %477 = vst [vmem:[%s2575_s16 + $0x108] sm:$0xff] %v476_v33 }
  0x78   : > { %479 = vst [vmem:[%s2575_s16 + $0x110] sm:$0xff] %v478_v34  ;;  %481 = vst [vmem:[%s2575_s16 + $0x118] sm:$0xff] %v480_v35  ;;  %v482_v36 = vld [vmem:[%s2570_s11 + $0x240] sm:$0xff]  ;;  %v484_v37 = vld [vmem:[%s2570_s11 + $0x248] sm:$0xff] }
  0x79   : > { %v486_v38 = vld [vmem:[%s2570_s11 + $0x260] sm:$0xff]  ;;  %483 = vst [vmem:[%s2575_s16 + $0x120] sm:$0xff] %v482_v36  ;;  %485 = vst [vmem:[%s2575_s16 + $0x128] sm:$0xff] %v484_v37  ;;  %v488_v39 = vld [vmem:[%s2570_s11 + $0x268] sm:$0xff] }
  0x7a   : > { %487 = vst [vmem:[%s2575_s16 + $0x130] sm:$0xff] %v486_v38  ;;  %v490_v40 = vld [vmem:[%s2570_s11 + $0x280] sm:$0xff]  ;;  %v492_v41 = vld [vmem:[%s2570_s11 + $0x288] sm:$0xff]  ;;  %489 = vst [vmem:[%s2575_s16 + $0x138] sm:$0xff] %v488_v39 }
  0x7b   : > { %491 = vst [vmem:[%s2575_s16 + $0x140] sm:$0xff] %v490_v40  ;;  %493 = vst [vmem:[%s2575_s16 + $0x148] sm:$0xff] %v492_v41  ;;  %v494_v42 = vld [vmem:[%s2570_s11 + $0x2a0] sm:$0xff]  ;;  %v496_v43 = vld [vmem:[%s2570_s11 + $0x2a8] sm:$0xff] }
  0x7c   : > { %v498_v44 = vld [vmem:[%s2570_s11 + $0x2c0] sm:$0xff]  ;;  %495 = vst [vmem:[%s2575_s16 + $0x150] sm:$0xff] %v494_v42  ;;  %497 = vst [vmem:[%s2575_s16 + $0x158] sm:$0xff] %v496_v43  ;;  %v500_v45 = vld [vmem:[%s2570_s11 + $0x2c8] sm:$0xff] }
  0x7d   : > { %499 = vst [vmem:[%s2575_s16 + $0x160] sm:$0xff] %v498_v44  ;;  %v502_v46 = vld [vmem:[%s2570_s11 + $0x2e0] sm:$0xff]  ;;  %v504_v47 = vld [vmem:[%s2570_s11 + $0x2e8] sm:$0xff]  ;;  %501 = vst [vmem:[%s2575_s16 + $0x168] sm:$0xff] %v500_v45 }
  0x7e   : > { %503 = vst [vmem:[%s2575_s16 + $0x170] sm:$0xff] %v502_v46  ;;  %505 = vst [vmem:[%s2575_s16 + $0x178] sm:$0xff] %v504_v47  ;;  %v506_v48 = vld [vmem:[%s2570_s11 + $0x300] sm:$0xff]  ;;  %v508_v49 = vld [vmem:[%s2570_s11 + $0x308] sm:$0xff] }
  0x7f   : > { %v510_v50 = vld [vmem:[%s2570_s11 + $0x320] sm:$0xff]  ;;  %507 = vst [vmem:[%s2575_s16 + $0x180] sm:$0xff] %v506_v48  ;;  %509 = vst [vmem:[%s2575_s16 + $0x188] sm:$0xff] %v508_v49  ;;  %v512_v51 = vld [vmem:[%s2570_s11 + $0x328] sm:$0xff] }
  0x80   : > { %511 = vst [vmem:[%s2575_s16 + $0x190] sm:$0xff] %v510_v50  ;;  %v514_v52 = vld [vmem:[%s2570_s11 + $0x340] sm:$0xff]  ;;  %v516_v53 = vld [vmem:[%s2570_s11 + $0x348] sm:$0xff]  ;;  %513 = vst [vmem:[%s2575_s16 + $0x198] sm:$0xff] %v512_v51 }
  0x81   : > { %515 = vst [vmem:[%s2575_s16 + $0x1a0] sm:$0xff] %v514_v52  ;;  %517 = vst [vmem:[%s2575_s16 + $0x1a8] sm:$0xff] %v516_v53  ;;  %v518_v54 = vld [vmem:[%s2570_s11 + $0x360] sm:$0xff]  ;;  %v520_v55 = vld [vmem:[%s2570_s11 + $0x368] sm:$0xff] }
  0x82   : > { %v522_v56 = vld [vmem:[%s2570_s11 + $0x380] sm:$0xff]  ;;  %519 = vst [vmem:[%s2575_s16 + $0x1b0] sm:$0xff] %v518_v54  ;;  %521 = vst [vmem:[%s2575_s16 + $0x1b8] sm:$0xff] %v520_v55  ;;  %v524_v57 = vld [vmem:[%s2570_s11 + $0x388] sm:$0xff] }
  0x83   : > { %523 = vst [vmem:[%s2575_s16 + $0x1c0] sm:$0xff] %v522_v56  ;;  %v526_v58 = vld [vmem:[%s2570_s11 + $0x3a0] sm:$0xff]  ;;  %v528_v59 = vld [vmem:[%s2570_s11 + $0x3a8] sm:$0xff]  ;;  %525 = vst [vmem:[%s2575_s16 + $0x1c8] sm:$0xff] %v524_v57 }
  0x84   : > { %527 = vst [vmem:[%s2575_s16 + $0x1d0] sm:$0xff] %v526_v58  ;;  %529 = vst [vmem:[%s2575_s16 + $0x1d8] sm:$0xff] %v528_v59  ;;  %v530_v60 = vld [vmem:[%s2570_s11 + $0x3c0] sm:$0xff]  ;;  %v532_v61 = vld [vmem:[%s2570_s11 + $0x3c8] sm:$0xff] }
  0x85   : > { %v534_v62 = vld [vmem:[%s2570_s11 + $0x3e0] sm:$0xff]  ;;  %531 = vst [vmem:[%s2575_s16 + $0x1e0] sm:$0xff] %v530_v60  ;;  %533 = vst [vmem:[%s2575_s16 + $0x1e8] sm:$0xff] %v532_v61  ;;  %v536_v63 = vld [vmem:[%s2570_s11 + $0x3e8] sm:$0xff] }
  0x86   : > { %535 = vst [vmem:[%s2575_s16 + $0x1f0] sm:$0xff] %v534_v62  ;;  %537 = vst [vmem:[%s2575_s16 + $0x1f8] sm:$0xff] %v536_v63 }
  0x87 PF: > { %p1695_p6 = scmp.ge.s32.totalorder %s2270_s12, 1  ;;  %p565_p7 = scmp.lt.s32.totalorder %s2270_s12, 17 }
  0x89   : > { %p566_p8 = pnand %p1695_p6, %p565_p7 }
  0x8a   : > { %s572_s2 = sand.u32 (!%p566_p8), 1, %s2238_s28   ;;  %s3198_s21 = sand.u32 (!%p566_p8), 1, %s2230_s27  }
  0x8b   : > { %569 = sbr.rel (%p566_p8) target bundleno = 769 (0x301), region = 78  ;;  %s1696_s11 = sshll.u32 (!%p566_p8), %s572_s2, 9 }
  0x8c   : > { %s1698_s18 = sshll.u32 (!%p566_p8), %s3198_s21, 7  ;;  %s1699_s17 = sshll.u32 (!%p566_p8), %s2254_s8, 3 }
  0x8d   : > { %p632_p9 = scmp.lt.s32.totalorder (!%p566_p8), %s1699_s17, 15  ;;  %s1702_s19 = sshll.u32 (!%p566_p8), %s2246_s30, 5 }
  0x8e   : > { %p641_p10 = scmp.lt.s32.totalorder (!%p566_p8), %s2250_s7, 3  ;;  %p643_p11 = scmp.lt.s32.totalorder (!%p566_p8), %s1702_s19, 63 }
  0x8f   : > { %p658_p12 = scmp.eq.s32.totalorder (!%p566_p8), %s2250_s7, 0  ;;  %p659_p13 = scmp.eq.s32.totalorder (!%p566_p8), %s2246_s30, 0 }
  0x90   : > { %s2733_s20 = scalar_lea.vmem (!%p566_p8), [#allocation7], %s1698_s18 }
  0x91   : > { %p660_p1 = pnand (!%p566_p8), %p659_p13, %p658_p12 }
  0x92   : > { %s3246_s17 = smov (!%p632_p9, %s1699_s17), 15  ;;  %s3248_s19 = smov (!%p643_p11, %s1702_s19), 63 }
  0x93   : > { %s642_s22 = scalar_select %p641_p10, %s2250_s7, 3 }
  0x94   : > { %s1732_s15 = sshll.u32 %s3246_s17, 4  ;;  %s1707_s14 = sshll.u32 %s3246_s17, 3  ;;  %v2273_v0 = vmov (!%p660_p1), 0.0  }
  0x95   : > { %s2715_s16 = scalar_lea.vmem %s3187_s1, %s1732_s15  ;;  %s1704_s28 = sshll.u32 %s642_s22, 7  ;;  %664 = vst [vmem:[#allocation2] sm:$0xff] (!%p660_p1), %v2273_v0  ;;  %665 = vst [vmem:[#allocation2 + $0x8] sm:$0xff] (!%p660_p1), %v2273_v0 }
  0x96   : > { %s2720_s21 = scalar_lea.vmem %s3191_s5, %s1707_s14  ;;  %s1703_s10 = sshll.u32 %s3248_s19, 1  ;;  %666 = vst [vmem:[#allocation2 + $0x10] sm:$0xff] (!%p660_p1), %v2273_v0  ;;  %667 = vst [vmem:[#allocation2 + $0x18] sm:$0xff] (!%p660_p1), %v2273_v0 }
  0x97   : > { %s647_s9 = sadd.s32 %s1704_s28, %s1703_s10  ;;  %s2729_s15 = scalar_lea.vmem [#allocation5], %s1696_s11  ;;  %668 = vst [vmem:[#allocation2 + $0x20] sm:$0xff] (!%p660_p1), %v2273_v0  ;;  %669 = vst [vmem:[#allocation2 + $0x28] sm:$0xff] (!%p660_p1), %v2273_v0 }
  0x98   : > { %s1705_s25 = sshll.u32 %s647_s9, 3  ;;  %s2731_s22 = scalar_lea.vmem [#allocation6], %s1696_s11  ;;  %670 = vst [vmem:[#allocation2 + $0x30] sm:$0xff] (!%p660_p1), %v2273_v0  ;;  %671 = vst [vmem:[#allocation2 + $0x38] sm:$0xff] (!%p660_p1), %v2273_v0 }
  0x99   : > { %s2727_s6 = scalar_lea.vmem %s3190_s4, %s1705_s25  ;;  %663 = sbr.rel (%p660_p1) target bundleno = 160 (0xa0), region = 90  ;;  %672 = vst [vmem:[#allocation2 + $0x40] sm:$0xff] (!%p660_p1), %v2273_v0  ;;  %673 = vst [vmem:[#allocation2 + $0x48] sm:$0xff] (!%p660_p1), %v2273_v0 }
  0x9a   : > { %674 = vst [vmem:[#allocation2 + $0x50] sm:$0xff] (!%p660_p1), %v2273_v0  ;;  %675 = vst [vmem:[#allocation2 + $0x58] sm:$0xff] (!%p660_p1), %v2273_v0 }
  0x9b   : > { %676 = vst [vmem:[#allocation2 + $0x60] sm:$0xff] (!%p660_p1), %v2273_v0  ;;  %677 = vst [vmem:[#allocation2 + $0x68] sm:$0xff] (!%p660_p1), %v2273_v0 }
  0x9c   : > { %678 = vst [vmem:[#allocation2 + $0x70] sm:$0xff] (!%p660_p1), %v2273_v0  ;;  %679 = vst [vmem:[#allocation2 + $0x78] sm:$0xff] (!%p660_p1), %v2273_v0 }
  0xa0 PF: > { %s680_s3 = sshra.s32 %s2250_s7, 7  ;;  %s685_s29 = sand.u32 127, %s2250_s7 }
  0xa1   : > { %s682_s9 = sadd.s32 %s2254_s8, %s680_s3 }
  0xa2   : > { %s1708_s10 = sshll.u32 %s682_s9, 7 }
  0xa3   : > { %s686_s25 = sadd.s32 %s1708_s10, %s685_s29 }
  0xa4   : > { %s687_s11 = sld [smem:[#allocation4 + %s686_s25]] }
  0xaa   : > { %p1709_p2 = scmp.le.s32.totalorder %s687_s11, 0 }
  0xab   : > { %v709_v1 = vld [vmem:[%s2729_s15 + $0x8] sm:$0xff] (!%p1709_p2)  ;;  %v711_v2 = vld [vmem:[%s2729_s15 + $0x18] sm:$0xff] (!%p1709_p2)  ;;  %v708_v3 = vld [vmem:[%s2729_s15] sm:$0xff] (!%p1709_p2)  ;;  %vm1082_vm1 = vcmask (!%p1709_p2), 31744  }
  0xac   : > { %691 = sbr.rel (%p1709_p2) target bundleno = 730 (0x2da), region = 94  ;;  %v1735_v4 = vpack.c.bf16 (!%p1709_p2), %v711_v2, %v709_v1  ;;  %v710_v5 = vld [vmem:[%s2729_s15 + $0x10] sm:$0xff] (!%p1709_p2)  ;;  %v713_v6 = vld [vmem:[%s2729_s15 + $0x28] sm:$0xff] (!%p1709_p2)  ;;  %v715_v7 = vld [vmem:[%s2729_s15 + $0x38] sm:$0xff] (!%p1709_p2) }
  0xad   : > { %v1737_v8 = vpack.c.bf16 (!%p1709_p2), %v710_v5, %v708_v3  ;;  %v1739_v9 = vpack.c.bf16 (!%p1709_p2), %v715_v7, %v713_v6  ;;  %v712_v10 = vld [vmem:[%s2729_s15 + $0x20] sm:$0xff] (!%p1709_p2)  ;;  %v714_v11 = vld [vmem:[%s2729_s15 + $0x30] sm:$0xff] (!%p1709_p2)  ;;  %v717_v12 = vld [vmem:[%s2729_s15 + $0x48] sm:$0xff] (!%p1709_p2) }
  0xae   : > { %1736 = vmatprep.subr.bf16.mxu0 (!%p1709_p2), %v1735_v4  ;;  %v719_v13 = vld [vmem:[%s2729_s15 + $0x58] sm:$0xff] (!%p1709_p2)  ;;  %v1741_v14 = vpack.c.bf16 (!%p1709_p2), %v714_v11, %v712_v10  ;;  %v716_v16 = vld [vmem:[%s2729_s15 + $0x40] sm:$0xff] (!%p1709_p2)  ;;  %v718_v17 = vld [vmem:[%s2729_s15 + $0x50] sm:$0xff] (!%p1709_p2) }
  0xaf   : > { %1738 = vmatpush1.bf16.msra.mxu0 (!%p1709_p2), %v1737_v8  ;;  %v1743_v15 = vpack.c.bf16 (!%p1709_p2), %v719_v13, %v717_v12  ;;  %v721_v18 = vld [vmem:[%s2729_s15 + $0x68] sm:$0xff] (!%p1709_p2)  ;;  %v723_v19 = vld [vmem:[%s2729_s15 + $0x78] sm:$0xff] (!%p1709_p2)  ;;  %v1745_v20 = vpack.c.bf16 (!%p1709_p2), %v718_v17, %v716_v16  ;;  %v720_v21 = vld [vmem:[%s2729_s15 + $0x60] sm:$0xff] (!%p1709_p2) }
  0xb0   : > { %1740 = vmatprep.subr.bf16.mxu0 (!%p1709_p2), %v1739_v9  ;;  %v1747_v22 = vpack.c.bf16 (!%p1709_p2), %v723_v19, %v721_v18  ;;  %v722_v23 = vld [vmem:[%s2729_s15 + $0x70] sm:$0xff] (!%p1709_p2)  ;;  %v886_v24 = vld [vmem:[%s2731_s22 + $0x8] sm:$0xff] (!%p1709_p2)  ;;  %v888_v25 = vld [vmem:[%s2731_s22 + $0x18] sm:$0xff] (!%p1709_p2) }
  0xb1   : > { %v725_v26 = vld [vmem:[%s2729_s15 + $0x88] sm:$0xff] (!%p1709_p2)  ;;  %v727_v27 = vld [vmem:[%s2729_s15 + $0x98] sm:$0xff] (!%p1709_p2)  ;;  %v1799_v28 = vpack.c.bf16 (!%p1709_p2), %v888_v25, %v886_v24  ;;  %v885_v29 = vld [vmem:[%s2731_s22] sm:$0xff] (!%p1709_p2)  ;;  %v1749_v31 = vpack.c.bf16 (!%p1709_p2), %v722_v23, %v720_v21 }
  0xb2   : > { %v887_v30 = vld [vmem:[%s2731_s22 + $0x10] sm:$0xff] (!%p1709_p2)  ;;  %v724_v32 = vld [vmem:[%s2729_s15 + $0x80] sm:$0xff] (!%p1709_p2)  ;;  %v890_v34 = vld [vmem:[%s2731_s22 + $0x28] sm:$0xff] (!%p1709_p2)  ;;  %v1751_v36 = vpack.c.bf16 (!%p1709_p2), %v727_v27, %v725_v26 }
  0xb3   : > { %1742 = vmatpush1.bf16.msra.mxu0 %v1741_v14  ;;  %1800 = vmatprep.subr.bf16.mxu1 %v1799_v28  ;;  %v1801_v33 = vpack.c.bf16 %v887_v30, %v885_v29  ;;  %v892_v35 = vld [vmem:[%s2731_s22 + $0x38] sm:$0xff]  ;;  %v726_v37 = vld [vmem:[%s2729_s15 + $0x90] sm:$0xff]  ;;  %v889_v39 = vld [vmem:[%s2731_s22 + $0x20] sm:$0xff] }
  0xb4   : > { %1744 = vmatprep.subr.bf16.mxu0 %v1743_v15  ;;  %v1803_v38 = vpack.c.bf16 %v892_v35, %v890_v34  ;;  %v891_v40 = vld [vmem:[%s2731_s22 + $0x30] sm:$0xff]  ;;  %v729_v41 = vld [vmem:[%s2729_s15 + $0xa8] sm:$0xff]  ;;  %v731_v42 = vld [vmem:[%s2729_s15 + $0xb8] sm:$0xff]  ;;  %v1753_v46 = vpack.c.bf16 %v726_v37, %v724_v32 }
  0xb5   : > { %1802 = vmatpush1.bf16.msra.mxu1 %v1801_v33  ;;  %v1805_v43 = vpack.c.bf16 %v891_v40, %v889_v39  ;;  %v894_v44 = vld [vmem:[%s2731_s22 + $0x48] sm:$0xff]  ;;  %v896_v45 = vld [vmem:[%s2731_s22 + $0x58] sm:$0xff]  ;;  %v728_v47 = vld [vmem:[%s2729_s15 + $0xa0] sm:$0xff]  ;;  %v1755_v51 = vpack.c.bf16 %v731_v42, %v729_v41 }
  0xb6   : > { %1804 = vmatprep.subr.bf16.mxu1 %v1803_v38  ;;  %v1807_v48 = vpack.c.bf16 %v896_v45, %v894_v44  ;;  %v893_v49 = vld [vmem:[%s2731_s22 + $0x40] sm:$0xff]  ;;  %v895_v50 = vld [vmem:[%s2731_s22 + $0x50] sm:$0xff]  ;;  %v898_v53 = vld [vmem:[%s2731_s22 + $0x68] sm:$0xff] }
  0xb7   : > { %1746 = vmatpush1.bf16.msra.mxu0 %v1745_v20  ;;  %v730_v52 = vld [vmem:[%s2729_s15 + $0xb0] sm:$0xff]  ;;  %v900_v54 = vld [vmem:[%s2731_s22 + $0x78] sm:$0xff]  ;;  %v733_v55 = vld [vmem:[%s2729_s15 + $0xc8] sm:$0xff]  ;;  %v1809_v57 = vpack.c.bf16 %v895_v50, %v893_v49 }
  0xb8   : > { %1748 = vmatprep.subr.bf16.mxu0 %v1747_v22  ;;  %v735_v56 = vld [vmem:[%s2729_s15 + $0xd8] sm:$0xff]  ;;  %v1811_v58 = vpack.c.bf16 %v900_v54, %v898_v53  ;;  %v897_v59 = vld [vmem:[%s2731_s22 + $0x60] sm:$0xff]  ;;  %v899_v60 = vld [vmem:[%s2731_s22 + $0x70] sm:$0xff]  ;;  %v1757_v61 = vpack.c.bf16 %v730_v52, %v728_v47 }
  0xb9   : > { %1806 = vmatpush1.bf16.msra.mxu1 %v1805_v43  ;;  %v902_v62 = vld [vmem:[%s2731_s22 + $0x88] sm:$0xff]  ;;  %v904_v63 = vld [vmem:[%s2731_s22 + $0x98] sm:$0xff]  ;;  %v1759_v0 = vpack.c.bf16 %v735_v56, %v733_v55  ;;  %v732_v1 = vld [vmem:[%s2729_s15 + $0xc0] sm:$0xff]  ;;  %v1813_v5 = vpack.c.bf16 %v899_v60, %v897_v59  ;;  %v1070_v55 = vlaneseq }
  0xba   : > { %1808 = vmatprep.subr.bf16.mxu1 %v1807_v48  ;;  %v734_v2 = vld [vmem:[%s2729_s15 + $0xd0] sm:$0xff]  ;;  %v737_v3 = vld [vmem:[%s2729_s15 + $0xe8] sm:$0xff]  ;;  %v739_v4 = vld [vmem:[%s2729_s15 + $0xf8] sm:$0xff]  ;;  %v1815_v6 = vpack.c.bf16 %v904_v63, %v902_v62 }
  0xbb   : > { %1750 = vmatpush1.bf16.msra.mxu0 %v1749_v31  ;;  %v901_v7 = vld [vmem:[%s2731_s22 + $0x80] sm:$0xff]  ;;  %v903_v8 = vld [vmem:[%s2731_s22 + $0x90] sm:$0xff]  ;;  %v1761_v9 = vpack.c.bf16 %v734_v2, %v732_v1  ;;  %v906_v10 = vld [vmem:[%s2731_s22 + $0xa8] sm:$0xff]  ;;  %v1763_v12 = vpack.c.bf16 %v739_v4, %v737_v3  ;;  %v1071_v4 = vand.u32 127, %v1070_v55 }
  0xbc   : > { %1752 = vmatprep.subr.bf16.mxu0 %v1751_v36  ;;  %v908_v11 = vld [vmem:[%s2731_s22 + $0xb8] sm:$0xff]  ;;  %v736_v13 = vld [vmem:[%s2729_s15 + $0xe0] sm:$0xff]  ;;  %v738_v14 = vld [vmem:[%s2729_s15 + $0xf0] sm:$0xff]  ;;  %v1817_v17 = vpack.c.bf16 %v903_v8, %v901_v7  ;;  %v1072_v8 = vstv %s2250_s7 }
  0xbd   : > { %1810 = vmatpush1.bf16.msra.mxu1 %v1809_v57  ;;  %v741_v15 = vld [vmem:[%s2729_s15 + $0x108] sm:$0xff]  ;;  %v743_v16 = vld [vmem:[%s2729_s15 + $0x118] sm:$0xff]  ;;  %v1819_v18 = vpack.c.bf16 %v908_v11, %v906_v10  ;;  %v905_v19 = vld [vmem:[%s2731_s22 + $0xa0] sm:$0xff]  ;;  %v1765_v21 = vpack.c.bf16 %v738_v14, %v736_v13  ;;  %vm2837_vm0 = vcmp.eq.s32.totalorder %v1071_v4, %v1072_v8 }
  0xbe   : > { %1812 = vmatprep.subr.bf16.mxu1 %v1811_v58  ;;  %v907_v20 = vld [vmem:[%s2731_s22 + $0xb0] sm:$0xff]  ;;  %v910_v22 = vld [vmem:[%s2731_s22 + $0xc8] sm:$0xff]  ;;  %v912_v23 = vld [vmem:[%s2731_s22 + $0xd8] sm:$0xff]  ;;  %v1767_v24 = vpack.c.bf16 %v743_v16, %v741_v15 }
  0xbf   : > { %1754 = vmatpush1.bf16.msra.mxu0 %v1753_v46  ;;  %v740_v25 = vld [vmem:[%s2729_s15 + $0x100] sm:$0xff]  ;;  %v742_v26 = vld [vmem:[%s2729_s15 + $0x110] sm:$0xff]  ;;  %v745_v27 = vld [vmem:[%s2729_s15 + $0x128] sm:$0xff]  ;;  %v1821_v29 = vpack.c.bf16 %v907_v20, %v905_v19  ;;  %v1823_v30 = vpack.c.bf16 %v912_v23, %v910_v22 }
  0xc0   : > { %1756 = vmatprep.subr.bf16.mxu0 %v1755_v51  ;;  %v747_v28 = vld [vmem:[%s2729_s15 + $0x138] sm:$0xff]  ;;  %v909_v31 = vld [vmem:[%s2731_s22 + $0xc0] sm:$0xff]  ;;  %v911_v32 = vld [vmem:[%s2731_s22 + $0xd0] sm:$0xff]  ;;  %v1769_v33 = vpack.c.bf16 %v742_v26, %v740_v25 }
  0xc1   : > { %1814 = vmatpush1.bf16.msra.mxu1 %v1813_v5  ;;  %v914_v34 = vld [vmem:[%s2731_s22 + $0xe8] sm:$0xff]  ;;  %v916_v35 = vld [vmem:[%s2731_s22 + $0xf8] sm:$0xff]  ;;  %v1771_v36 = vpack.c.bf16 %v747_v28, %v745_v27  ;;  %v744_v37 = vld [vmem:[%s2729_s15 + $0x120] sm:$0xff]  ;;  %v1825_v42 = vpack.c.bf16 %v911_v32, %v909_v31 }
  0xc2   : > { %1816 = vmatprep.subr.bf16.mxu1 %v1815_v6  ;;  %v746_v38 = vld [vmem:[%s2729_s15 + $0x130] sm:$0xff]  ;;  %v693_v39 = vld [vmem:[%s2715_s16 + $0x8] sm:$0xff]  ;;  %v751_v41 = vld [vmem:[%s2729_s15 + $0x158] sm:$0xff]  ;;  %v1827_v43 = vpack.c.bf16 %v916_v35, %v914_v34 }
  0xc3   : > { %1758 = vmatpush1.bf16.msra.mxu0 %v1757_v61  ;;  %v749_v40 = vld [vmem:[%s2729_s15 + $0x148] sm:$0xff]  ;;  %836 = vmatprep.mubr.f32.mxu0 %v693_v39  ;;  %v913_v44 = vld [vmem:[%s2731_s22 + $0xe0] sm:$0xff]  ;;  %v915_v45 = vld [vmem:[%s2731_s22 + $0xf0] sm:$0xff]  ;;  %v1773_v46 = vpack.c.bf16 %v746_v38, %v744_v37 }
  0xc4   : > { %1760 = vmatprep.subr.bf16.mxu0 %v1759_v0  ;;  %1013 = vmatprep.mubr.f32.mxu1 %v693_v39  ;;  %v918_v47 = vld [vmem:[%s2731_s22 + $0x108] sm:$0xff]  ;;  %v920_v48 = vld [vmem:[%s2731_s22 + $0x118] sm:$0xff]  ;;  %v1775_v49 = vpack.c.bf16 %v751_v41, %v749_v40  ;;  %v748_v50 = vld [vmem:[%s2729_s15 + $0x140] sm:$0xff]  ;;  %v1829_v54 = vpack.c.bf16 %v915_v45, %v913_v44 }
  0xc5   : > { %1818 = vmatpush1.bf16.msra.mxu1 %v1817_v17  ;;  %v750_v51 = vld [vmem:[%s2729_s15 + $0x150] sm:$0xff]  ;;  %v753_v52 = vld [vmem:[%s2729_s15 + $0x168] sm:$0xff]  ;;  %v755_v53 = vld [vmem:[%s2729_s15 + $0x178] sm:$0xff]  ;;  %v1831_v56 = vpack.c.bf16 %v920_v48, %v918_v47 }
  0xc6   : > { %1820 = vmatprep.subr.bf16.mxu1 %v1819_v18  ;;  %v917_v57 = vld [vmem:[%s2731_s22 + $0x100] sm:$0xff]  ;;  %v919_v58 = vld [vmem:[%s2731_s22 + $0x110] sm:$0xff]  ;;  %v1777_v59 = vpack.c.bf16 %v750_v51, %v748_v50  ;;  %v922_v60 = vld [vmem:[%s2731_s22 + $0x128] sm:$0xff]  ;;  %v1779_v62 = vpack.c.bf16 %v755_v53, %v753_v52 }
  0xc7   : > { %1762 = vmatpush1.bf16.msra.mxu0 %v1761_v9  ;;  %v924_v61 = vld [vmem:[%s2731_s22 + $0x138] sm:$0xff]  ;;  %v752_v63 = vld [vmem:[%s2729_s15 + $0x160] sm:$0xff]  ;;  %v754_v0 = vld [vmem:[%s2729_s15 + $0x170] sm:$0xff]  ;;  %v1833_v3 = vpack.c.bf16 %v919_v58, %v917_v57 }
  0xc8   : > { %1764 = vmatprep.subr.bf16.mxu0 %v1763_v12  ;;  %v757_v1 = vld [vmem:[%s2729_s15 + $0x188] sm:$0xff]  ;;  %v759_v2 = vld [vmem:[%s2729_s15 + $0x198] sm:$0xff]  ;;  %v1835_v5 = vpack.c.bf16 %v924_v61, %v922_v60  ;;  %v921_v6 = vld [vmem:[%s2731_s22 + $0x120] sm:$0xff]  ;;  %v1781_v9 = vpack.c.bf16 %v754_v0, %v752_v63 }
  0xc9   : > { %1822 = vmatpush1.bf16.msra.mxu1 %v1821_v29  ;;  %v923_v7 = vld [vmem:[%s2731_s22 + $0x130] sm:$0xff]  ;;  %v926_v10 = vld [vmem:[%s2731_s22 + $0x148] sm:$0xff]  ;;  %v928_v11 = vld [vmem:[%s2731_s22 + $0x158] sm:$0xff]  ;;  %v1783_v12 = vpack.c.bf16 %v759_v2, %v757_v1 }
  0xca   : > { %1824 = vmatprep.subr.bf16.mxu1 %v1823_v30  ;;  %v756_v13 = vld [vmem:[%s2729_s15 + $0x180] sm:$0xff]  ;;  %v758_v14 = vld [vmem:[%s2729_s15 + $0x190] sm:$0xff]  ;;  %v761_v15 = vld [vmem:[%s2729_s15 + $0x1a8] sm:$0xff]  ;;  %v1837_v17 = vpack.c.bf16 %v923_v7, %v921_v6  ;;  %v1839_v20 = vpack.c.bf16 %v928_v11, %v926_v10 }
  0xcb   : > { %1766 = vmatpush1.bf16.msra.mxu0 %v1765_v21  ;;  %v763_v16 = vld [vmem:[%s2729_s15 + $0x1b8] sm:$0xff]  ;;  %v925_v18 = vld [vmem:[%s2731_s22 + $0x140] sm:$0xff]  ;;  %v927_v21 = vld [vmem:[%s2731_s22 + $0x150] sm:$0xff] }
  0xcc   : > { %1768 = vmatprep.subr.bf16.mxu0 %v1767_v24  ;;  %v930_v22 = vld [vmem:[%s2731_s22 + $0x168] sm:$0xff]  ;;  %v932_v23 = vld [vmem:[%s2731_s22 + $0x178] sm:$0xff]  ;;  %v1785_v24 = vpack.c.bf16 %v758_v14, %v756_v13  ;;  %v1062_v25 = vld [vmem:[%s2720_s21] sm:$0xff]  ;;  %v1787_v28 = vpack.c.bf16 %v763_v16, %v761_v15  ;;  %v1841_v37 = vpack.c.bf16 %v927_v21, %v925_v18 }
  0xcd   : > { %1826 = vmatpush1.bf16.msra.mxu1 %v1825_v42  ;;  %v1063_v26 = vld [vmem:[%s2720_s21 + $0x8] sm:$0xff]  ;;  %v1066_v27 = vld [vmem:[%s2720_s21 + $0x20] sm:$0xff]  ;;  %v762_v30 = vld [vmem:[%s2729_s15 + $0x1b0] sm:$0xff]  ;;  %v1074_v31 = vsel %vm2837_vm0, %v1062_v25, 0.0  ;;  %v1843_v41 = vpack.c.bf16 %v932_v23, %v930_v22 }
  0xce   : > { %1828 = vmatprep.subr.bf16.mxu1 %v1827_v43  ;;  %v760_v29 = vld [vmem:[%s2729_s15 + $0x1a0] sm:$0xff]  ;;  %v1075_v32 = vsel %vm2837_vm0, %v1063_v26, 0.0  ;;  %v1067_v34 = vld [vmem:[%s2720_s21 + $0x28] sm:$0xff]  ;;  %v1083_v38 = vsel %vm1082_vm1, %v1074_v31, 0.0  ;;  %v1064_v40 = vld [vmem:[%s2720_s21 + $0x10] sm:$0xff] }
  0xcf   : > { %1770 = vmatpush1.bf16.msra.mxu0 %v1769_v33  ;;  %v1078_v33 = vsel %vm2837_vm0, %v1066_v27, 0.0  ;;  %v765_v35 = vld [vmem:[%s2729_s15 + $0x1c8] sm:$0xff]  ;;  %v1086_v39 = vsel %vm1082_vm1, %v1075_v32, 0.0  ;;  %v929_v42 = vld [vmem:[%s2731_s22 + $0x160] sm:$0xff]  ;;  %v931_v43 = vld [vmem:[%s2731_s22 + $0x170] sm:$0xff]  ;;  %1084 = vadd.xlane.f32.xlu0 %v1083_v38  ;;  %v1079_v44 = vsel %vm2837_vm0, %v1067_v34, 0.0 }
  0xd0   : > { %1772 = vmatprep.subr.bf16.mxu0 %v1771_v36  ;;  %v767_v36 = vld [vmem:[%s2729_s15 + $0x1d8] sm:$0xff]  ;;  %v1068_v45 = vld [vmem:[%s2720_s21 + $0x30] sm:$0xff]  ;;  %v934_v47 = vld [vmem:[%s2731_s22 + $0x188] sm:$0xff]  ;;  %1087 = vadd.xlane.f32.xlu1 %v1086_v39  ;;  %v1076_v53 = vsel %vm2837_vm0, %v1064_v40, 0.0  ;;  %v1845_v57 = vpack.c.bf16 %v931_v43, %v929_v42 }
  0xd1   : > { %1830 = vmatpush1.bf16.msra.mxu1 %v1829_v54  ;;  %v936_v48 = vld [vmem:[%s2731_s22 + $0x198] sm:$0xff]  ;;  %v1791_v50 = vpack.c.bf16 %v767_v36, %v765_v35  ;;  %v764_v51 = vld [vmem:[%s2729_s15 + $0x1c0] sm:$0xff]  ;;  %v766_v52 = vld [vmem:[%s2729_s15 + $0x1d0] sm:$0xff]  ;;  %v1098_v54 = vsel %vm1082_vm1, %v1079_v44, 0.0 }
  0xd2   : > { %1832 = vmatprep.subr.bf16.mxu1 %v1831_v56  ;;  %v769_v55 = vld [vmem:[%s2729_s15 + $0x1e8] sm:$0xff]  ;;  %v771_v56 = vld [vmem:[%s2729_s15 + $0x1f8] sm:$0xff]  ;;  %v1847_v60 = vpack.c.bf16 %v936_v48, %v934_v47  ;;  %v933_v61 = vld [vmem:[%s2731_s22 + $0x180] sm:$0xff]  ;;  %v1793_v0 = vpack.c.bf16 %v766_v52, %v764_v51 }
  0xd3   : > { %1774 = vmatpush1.bf16.msra.mxu0 %v1773_v46  ;;  %v1789_v46 = vpack.c.bf16 %v762_v30, %v760_v29  ;;  %v1065_v58 = vld [vmem:[%s2720_s21 + $0x18] sm:$0xff]  ;;  %v938_v1 = vld [vmem:[%s2731_s22 + $0x1a8] sm:$0xff]  ;;  %v1795_v4 = vpack.c.bf16 %v771_v56, %v769_v55  ;;  %v770_v6 = vld [vmem:[%s2729_s15 + $0x1f0] sm:$0xff] }
  0xd4   : > { %1776 = vmatprep.subr.bf16.mxu0 %v1775_v49  ;;  %v1095_v49 = vsel %vm1082_vm1, %v1078_v33, 0.0  ;;  %v1069_v63 = vld [vmem:[%s2720_s21 + $0x38] sm:$0xff]  ;;  %1099 = vadd.xlane.f32.xlu1 %v1098_v54  ;;  %v1077_v7 = vsel %vm2837_vm0, %v1065_v58, 0.0  ;;  %v1268_v11 = vld [vmem:[%s2727_s6 + $0x8] sm:$0xff]  ;;  %v937_v14 = vld [vmem:[%s2731_s22 + $0x1a0] sm:$0xff] }
  0xd5   : > { %1834 = vmatpush1.bf16.msra.mxu1 %v1833_v3  ;;  %1096 = vadd.xlane.f32.xlu0 %v1095_v49  ;;  %v940_v2 = vld [vmem:[%s2731_s22 + $0x1b8] sm:$0xff]  ;;  %v1089_v3 = vsel %vm1082_vm1, %v1076_v53, 0.0  ;;  %v1081_v10 = vsel %vm2837_vm0, %v1069_v63, 0.0  ;;  %v939_v15 = vld [vmem:[%s2731_s22 + $0x1b0] sm:$0xff]  ;;  %v1092_v19 = vsel %vm1082_vm1, %v1077_v7, 0.0  ;;  %v1267_v22 = vld [vmem:[%s2727_s6] sm:$0xff] }
  0xd6   : > { %1836 = vmatprep.subr.bf16.mxu1 %v1835_v5  ;;  %v768_v5 = vld [vmem:[%s2729_s15 + $0x1e0] sm:$0xff]  ;;  %v1851_v13 = vpack.c.bf16 %v940_v2, %v938_v1  ;;  %v944_v18 = vld [vmem:[%s2731_s22 + $0x1d8] sm:$0xff]  ;;  %v1269_v23 = vld [vmem:[%s2727_s6 + $0x10] sm:$0xff] }
  0xd7   : > { %1778 = vmatpush1.bf16.msra.mxu0 %v1777_v59  ;;  %v1080_v59 = vsel %vm2837_vm0, %v1068_v45, 0.0  ;;  %v1797_v16 = vpack.c.bf16 %v770_v6, %v768_v5  ;;  %v1272_v25 = vld [vmem:[%s2727_s6 + $0x28] sm:$0xff]  ;;  %v1274_v26 = vld [vmem:[%s2727_s6 + $0x38] sm:$0xff]  ;;  %v943_v29 = vld [vmem:[%s2731_s22 + $0x1d0] sm:$0xff]  ;;  %v1865_v33 = vpack.c.bf16 %v1269_v23, %v1267_v22 }
  0xd8   : > { %1780 = vmatprep.subr.bf16.mxu0 %v1779_v62  ;;  %v935_v62 = vld [vmem:[%s2731_s22 + $0x190] sm:$0xff]  ;;  %v1101_v8 = vsel %vm1082_vm1, %v1080_v59, 0.0  ;;  %v692_v30 = vld [vmem:[%s2715_s16] sm:$0xff]  ;;  %v946_v31 = vld [vmem:[%s2731_s22 + $0x1e8] sm:$0xff]  ;;  %v1867_v35 = vpack.c.bf16 %v1274_v26, %v1272_v25 }
  0xd9   : > { %1838 = vmatpush1.bf16.msra.mxu1 %v1837_v17  ;;  %1090 = vadd.xlane.f32.xlu0 %v1089_v3  ;;  %v942_v17 = vld [vmem:[%s2731_s22 + $0x1c8] sm:$0xff]  ;;  %v948_v32 = vld [vmem:[%s2731_s22 + $0x1f8] sm:$0xff]  ;;  %v1271_v36 = vld [vmem:[%s2727_s6 + $0x20] sm:$0xff] }
  0xda   : > { %1840 = vmatprep.subr.bf16.mxu1 %v1839_v20  ;;  %1102 = vadd.xlane.f32.xlu1 %v1101_v8  ;;  %v1104_v20 = vsel %vm1082_vm1, %v1081_v10, 0.0  ;;  %v1855_v27 = vpack.c.bf16 %v944_v18, %v942_v17  ;;  %v695_v34 = vld [vmem:[%s2715_s16 + $0x18] sm:$0xff]  ;;  %v1276_v39 = vld [vmem:[%s2727_s6 + $0x48] sm:$0xff]  ;;  %v945_v42 = vld [vmem:[%s2731_s22 + $0x1e0] sm:$0xff] }
  0xdb   : > { %1782 = vmatpush1.bf16.msra.mxu0 %v1781_v9  ;;  %v1849_v9 = vpack.c.bf16 %v935_v62, %v933_v61  ;;  %v1278_v40 = vld [vmem:[%s2727_s6 + $0x58] sm:$0xff]  ;;  %v947_v43 = vld [vmem:[%s2731_s22 + $0x1f0] sm:$0xff]  ;;  %v1275_v48 = vld [vmem:[%s2727_s6 + $0x40] sm:$0xff] }
  0xdc   : > { %1784 = vmatprep.subr.bf16.mxu0 %v1783_v12  ;;  %v1270_v12 = vld [vmem:[%s2727_s6 + $0x18] sm:$0xff]  ;;  %v694_v44 = vld [vmem:[%s2715_s16 + $0x10] sm:$0xff]  ;;  %v1871_v47 = vpack.c.bf16 %v1278_v40, %v1276_v39  ;;  %v1280_v51 = vld [vmem:[%s2727_s6 + $0x68] sm:$0xff] }
  0xdd   : > { %1842 = vmatpush1.bf16.msra.mxu1 %v1841_v37  ;;  %v1863_v21 = vpack.c.bf16 %v1270_v12, %v1268_v11  ;;  %1093 = vadd.xlane.f32.xlu0 %v1092_v19  ;;  %v1273_v37 = vld [vmem:[%s2727_s6 + $0x30] sm:$0xff]  ;;  %v1282_v52 = vld [vmem:[%s2727_s6 + $0x78] sm:$0xff]  ;;  %v696_v53 = vld [vmem:[%s2715_s16 + $0x20] sm:$0xff] }
  0xde   : > { %1844 = vmatprep.subr.bf16.mxu1 %v1843_v41  ;;  %1105 = vadd.xlane.f32.xlu1 %v1104_v20  ;;  %v1859_v41 = vpack.c.bf16 %v948_v32, %v946_v31  ;;  %v1869_v45 = vpack.c.bf16 %v1273_v37, %v1271_v36  ;;  %v1277_v49 = vld [vmem:[%s2727_s6 + $0x50] sm:$0xff]  ;;  %v699_v55 = vld [vmem:[%s2715_s16 + $0x38] sm:$0xff]  ;;  %v1875_v56 = vpack.c.bf16 %v1282_v52, %v1280_v51  ;;  %v1284_v59 = vld [vmem:[%s2727_s6 + $0x88] sm:$0xff] }
  0xdf   : > { %1786 = vmatpush1.bf16.msra.mxu0 %v1785_v24  ;;  %v1853_v24 = vpack.c.bf16 %v939_v15, %v937_v14  ;;  %v1873_v54 = vpack.c.bf16 %v1277_v49, %v1275_v48  ;;  %v1281_v58 = vld [vmem:[%s2727_s6 + $0x70] sm:$0xff]  ;;  %v701_v63 = vld [vmem:[%s2715_s16 + $0x48] sm:$0xff]  ;;  %v1283_v1 = vld [vmem:[%s2727_s6 + $0x80] sm:$0xff] }
  0xe0   : > { %1788 = vmatprep.subr.bf16.mxu0 %v1787_v28  ;;  %v941_v28 = vld [vmem:[%s2731_s22 + $0x1c0] sm:$0xff]  ;;  %v698_v61 = vld [vmem:[%s2715_s16 + $0x30] sm:$0xff]  ;;  %v1288_v3 = vld [vmem:[%s2727_s6 + $0xa8] sm:$0xff] }
  0xe1   : > { %1846 = vmatpush1.bf16.msra.mxu1 %v1845_v57  ;;  %v1857_v38 = vpack.c.bf16 %v943_v29, %v941_v28  ;;  %v1279_v57 = vld [vmem:[%s2727_s6 + $0x60] sm:$0xff]  ;;  %v1285_v2 = vld [vmem:[%s2727_s6 + $0x90] sm:$0xff]  ;;  %v703_v7 = vld [vmem:[%s2715_s16 + $0x58] sm:$0xff] }
  0xe2   : > { %1848 = vmatprep.subr.bf16.mxu1 %v1847_v60  ;;  %v1286_v60 = vld [vmem:[%s2727_s6 + $0x98] sm:$0xff]  ;;  %v1877_v62 = vpack.c.bf16 %v1281_v58, %v1279_v57  ;;  %v700_v5 = vld [vmem:[%s2715_s16 + $0x40] sm:$0xff]  ;;  %v1881_v6 = vpack.c.bf16 %v1285_v2, %v1283_v1  ;;  %v1289_v10 = vld [vmem:[%s2727_s6 + $0xb0] sm:$0xff] }
  0xe3   : > { %1790 = vmatpush1.bf16.msra.mxu0 %v1789_v46  ;;  %v697_v46 = vld [vmem:[%s2715_s16 + $0x28] sm:$0xff]  ;;  %v1294_v12 = vld [vmem:[%s2727_s6 + $0xd8] sm:$0xff]  ;;  %v1291_v17 = vld [vmem:[%s2727_s6 + $0xc0] sm:$0xff] }
  0xe4   : > { %1792 = vmatprep.subr.bf16.mxu0 %v1791_v50  ;;  %v1861_v50 = vpack.c.bf16 %v947_v43, %v945_v42  ;;  %v1292_v11 = vld [vmem:[%s2727_s6 + $0xc8] sm:$0xff]  ;;  %v1293_v18 = vld [vmem:[%s2727_s6 + $0xd0] sm:$0xff]  ;;  %v1298_v20 = vld [vmem:[%s2727_s6 + $0xf8] sm:$0xff] }
  0xe5   : > { %1850 = vmatpush1.bf16.msra.mxu1 %v1849_v9  ;;  %v1287_v9 = vld [vmem:[%s2727_s6 + $0xa0] sm:$0xff]  ;;  %v705_v15 = vld [vmem:[%s2715_s16 + $0x68] sm:$0xff]  ;;  %v1889_v22 = vpack.c.bf16 %v1293_v18, %v1291_v17  ;;  %v707_v23 = vld [vmem:[%s2715_s16 + $0x78] sm:$0xff] }
  0xe6   : > { %1852 = vmatprep.subr.bf16.mxu1 %v1851_v13  ;;  %v702_v13 = vld [vmem:[%s2715_s16 + $0x50] sm:$0xff]  ;;  %v1885_v14 = vpack.c.bf16 %v1289_v10, %v1287_v9  ;;  %v1296_v19 = vld [vmem:[%s2727_s6 + $0xe8] sm:$0xff]  ;;  %v1295_v26 = vld [vmem:[%s2727_s6 + $0xe0] sm:$0xff] }
  0xe7   : > { %1794 = vmatpush1.bf16.msra.mxu0 %v1793_v0  ;;  %v1879_v0 = vpack.c.bf16 %v1286_v60, %v1284_v59  ;;  %v706_v25 = vld [vmem:[%s2715_s16 + $0x70] sm:$0xff]  ;;  %v1300_v29 = vld [vmem:[%s2727_s6 + $0x108] sm:$0xff]  ;;  %v1299_v32 = vld [vmem:[%s2727_s6 + $0x100] sm:$0xff] }
  0xe8   : > { %1796 = vmatprep.subr.bf16.mxu0 %v1795_v4  ;;  %v1290_v4 = vld [vmem:[%s2727_s6 + $0xb8] sm:$0xff]  ;;  %v1305_v39 = vld [vmem:[%s2727_s6 + $0x130] sm:$0xff]  ;;  %v1320_v59 = vld [vmem:[%s2727_s6 + $0x1a8] sm:$0xff] }
  0xe9   : > { %1854 = vmatpush1.bf16.msra.mxu1 %v1853_v24  ;;  %v1883_v8 = vpack.c.bf16 %v1290_v4, %v1288_v3  ;;  %v1891_v24 = vpack.c.bf16 %v1298_v20, %v1296_v19  ;;  %v1306_v36 = vld [vmem:[%s2727_s6 + $0x138] sm:$0xff]  ;;  %v1313_v51 = vld [vmem:[%s2727_s6 + $0x170] sm:$0xff]  ;;  %v1324_v1 = vld [vmem:[%s2727_s6 + $0x1c8] sm:$0xff] }
  0xea   : > { %1856 = vmatprep.subr.bf16.mxu1 %v1855_v27  ;;  %v1297_v27 = vld [vmem:[%s2727_s6 + $0xf0] sm:$0xff]  ;;  %v1310_v42 = vld [vmem:[%s2727_s6 + $0x158] sm:$0xff]  ;;  %v1323_v4 = vld [vmem:[%s2727_s6 + $0x1c0] sm:$0xff] }
  0xeb   : > { %1798 = vmatpush1.bf16.msra.mxu0 %v1797_v16  ;;  %v1887_v16 = vpack.c.bf16 %v1294_v12, %v1292_v11  ;;  %v1893_v28 = vpack.c.bf16 %v1297_v27, %v1295_v26  ;;  %v1314_v48 = vld [vmem:[%s2727_s6 + $0x178] sm:$0xff]  ;;  %v1317_v57 = vld [vmem:[%s2727_s6 + $0x190] sm:$0xff]  ;;  %v1327_v10 = vld [vmem:[%s2727_s6 + $0x1e0] sm:$0xff] }
  0xec   : > { %1864 = vmatprep.subr.bf16.mxu0 %v1863_v21  ;;  %v1322_v60 = vld [vmem:[%s2727_s6 + $0x1b8] sm:$0xff]  ;;  %v1329_v11 = vld [vmem:[%s2727_s6 + $0x1f0] sm:$0xff] }
  0xed   : > { %1858 = vmatpush1.bf16.msra.mxu1 %v1857_v38  ;;  %v1303_v38 = vld [vmem:[%s2727_s6 + $0x120] sm:$0xff]  ;;  %v1326_v2 = vld [vmem:[%s2727_s6 + $0x1d8] sm:$0xff]  ;;  %v1925_v12 = vpack.c.bf16 %v1329_v11, %v1327_v10 }
  0xee   : > { %837 = vmatmul.mubr.f32.vlgmr.msra.gmra.mrb[0].mxu0 %v692_v30  ;;  %1860 = vmatprep.subr.bf16.mxu1 %v1859_v41  ;;  %v1901_v40 = vpack.c.bf16 %v1305_v39, %v1303_v38  ;;  %v1308_v41 = vld [vmem:[%s2727_s6 + $0x148] sm:$0xff]  ;;  %v1919_v3 = vpack.c.bf16 %v1326_v2, %v1324_v1 }
  0xef   : > { %842 = vmatprep.mubr.f32.mxu0 %v695_v34  ;;  %1866 = vmatpush1.bf16.msra.mxu0 %v1865_v33  ;;  %v1903_v43 = vpack.c.bf16 %v1310_v42, %v1308_v41 }
  0xf0   : > { %1868 = vmatprep.subr.bf16.mxu0 %v1867_v35 }
  0xf1   : > { %1862 = vmatpush1.bf16.msra.mxu1 %v1861_v50  ;;  %v1311_v50 = vld [vmem:[%s2727_s6 + $0x160] sm:$0xff] }
  0xf2   : > { %843 = vmatmul.mubr.f32.gmra.mrb[2].mxu0 %v694_v44  ;;  %1927 = vmatprep.subr.bf16.mxu1 %v1863_v21  ;;  %v704_v21 = vld [vmem:[%s2715_s16 + $0x60] sm:$0xff]  ;;  %v1909_v52 = vpack.c.bf16 %v1313_v51, %v1311_v50 }
  0xf3   : > { %848 = vmatprep.mubr.f32.mxu0 %v697_v46  ;;  %1870 = vmatpush1.bf16.msra.mxu0 %v1869_v45 }
  0xf4   : > { %1872 = vmatprep.subr.bf16.mxu0 %v1871_v47  ;;  %1014 = vmatmul.mubr.f32.vlgmr.msra.gmra.mrb[0].mxu1 %v692_v30  ;;  %v1302_v30 = vld [vmem:[%s2727_s6 + $0x118] sm:$0xff] }
  0xf5   : > { %1019 = vmatprep.mubr.f32.mxu1 %v695_v34  ;;  %1943 = vmatpush1.bf16.msra.mxu1 %v1865_v33  ;;  %v1895_v31 = vpack.c.bf16 %v1302_v30, %v1300_v29  ;;  %v1301_v33 = vld [vmem:[%s2727_s6 + $0x110] sm:$0xff] }
  0xf6   : > { %849 = vmatmul.mubr.f32.gmra.mrb[4].mxu0 %v696_v53  ;;  %1928 = vmatprep.subr.bf16.mxu1 %v1867_v35  ;;  %v1897_v34 = vpack.c.bf16 %v1301_v33, %v1299_v32  ;;  %v1304_v35 = vld [vmem:[%s2727_s6 + $0x128] sm:$0xff] }
  0xf7   : > { %854 = vmatprep.mubr.f32.mxu0 %v699_v55  ;;  %1874 = vmatpush1.bf16.msra.mxu0 %v1873_v54  ;;  %v1899_v37 = vpack.c.bf16 %v1306_v36, %v1304_v35 }
  0xf8   : > { %1876 = vmatprep.subr.bf16.mxu0 %v1875_v56  ;;  %1020 = vmatmul.mubr.f32.gmra.mrb[2].mxu1 %v694_v44  ;;  %v1307_v44 = vld [vmem:[%s2727_s6 + $0x140] sm:$0xff] }
  0xf9   : > { %1025 = vmatprep.mubr.f32.mxu1 %v697_v46  ;;  %1944 = vmatpush1.bf16.msra.mxu1 %v1869_v45  ;;  %v1309_v45 = vld [vmem:[%s2727_s6 + $0x150] sm:$0xff] }
  0xfa   : > { %855 = vmatmul.mubr.f32.gmra.mrb[6].mxu0 %v698_v61  ;;  %1929 = vmatprep.subr.bf16.mxu1 %v1871_v47  ;;  %v1905_v46 = vpack.c.bf16 %v1309_v45, %v1307_v44  ;;  %v1312_v47 = vld [vmem:[%s2727_s6 + $0x168] sm:$0xff] }
  0xfb   : > { %860 = vmatprep.mubr.f32.mxu0 %v701_v63  ;;  %1878 = vmatpush1.bf16.msra.mxu0 %v1877_v62  ;;  %v1907_v49 = vpack.c.bf16 %v1314_v48, %v1312_v47 }
  0xfc   : > { %1880 = vmatprep.subr.bf16.mxu0 %v1879_v0  ;;  %1026 = vmatmul.mubr.f32.gmra.mrb[4].mxu1 %v696_v53  ;;  %v1316_v53 = vld [vmem:[%s2727_s6 + $0x188] sm:$0xff] }
  0xfd   : > { %1031 = vmatprep.mubr.f32.mxu1 %v699_v55  ;;  %1945 = vmatpush1.bf16.msra.mxu1 %v1873_v54  ;;  %v1318_v54 = vld [vmem:[%s2727_s6 + $0x198] sm:$0xff] }
  0xfe   : > { %861 = vmatmul.mubr.f32.gmra.mrb[8].mxu0 %v700_v5  ;;  %1930 = vmatprep.subr.bf16.mxu1 %v1875_v56  ;;  %v1911_v55 = vpack.c.bf16 %v1318_v54, %v1316_v53  ;;  %v1315_v56 = vld [vmem:[%s2727_s6 + $0x180] sm:$0xff] }
  0xff   : > { %866 = vmatprep.mubr.f32.mxu0 %v703_v7  ;;  %1882 = vmatpush1.bf16.msra.mxu0 %v1881_v6  ;;  %v1913_v58 = vpack.c.bf16 %v1317_v57, %v1315_v56 }
 0x100   : > { %1884 = vmatprep.subr.bf16.mxu0 %v1883_v8  ;;  %1032 = vmatmul.mubr.f32.gmra.mrb[6].mxu1 %v698_v61  ;;  %v1915_v61 = vpack.c.bf16 %v1322_v60, %v1320_v59 }
 0x101   : > { %1037 = vmatprep.mubr.f32.mxu1 %v701_v63  ;;  %1946 = vmatpush1.bf16.msra.mxu1 %v1877_v62  ;;  %v1319_v62 = vld [vmem:[%s2727_s6 + $0x1a0] sm:$0xff]  ;;  %v1321_v63 = vld [vmem:[%s2727_s6 + $0x1b0] sm:$0xff] }
 0x102   : > { %867 = vmatmul.mubr.f32.gmra.mrb[10].mxu0 %v702_v13  ;;  %1931 = vmatprep.subr.bf16.mxu1 %v1879_v0  ;;  %v1917_v0 = vpack.c.bf16 %v1321_v63, %v1319_v62 }
 0x103   : > { %872 = vmatprep.mubr.f32.mxu0 %v705_v15  ;;  %1886 = vmatpush1.bf16.msra.mxu0 %v1885_v14 }
 0x104   : > { %1888 = vmatprep.subr.bf16.mxu0 %v1887_v16  ;;  %1038 = vmatmul.mubr.f32.gmra.mrb[8].mxu1 %v700_v5  ;;  %v1325_v5 = vld [vmem:[%s2727_s6 + $0x1d0] sm:$0xff] }
 0x105   : > { %1043 = vmatprep.mubr.f32.mxu1 %v703_v7  ;;  %1947 = vmatpush1.bf16.msra.mxu1 %v1881_v6  ;;  %v1921_v6 = vpack.c.bf16 %v1325_v5, %v1323_v4  ;;  %v1328_v7 = vld [vmem:[%s2727_s6 + $0x1e8] sm:$0xff] }
 0x106   : > { %873 = vmatmul.mubr.f32.gmra.mrb[12].mxu0 %v704_v21  ;;  %1932 = vmatprep.subr.bf16.mxu1 %v1883_v8  ;;  %v1330_v8 = vld [vmem:[%s2727_s6 + $0x1f8] sm:$0xff] }
 0x107   : > { %878 = vmatprep.mubr.f32.mxu0 %v707_v23  ;;  %1890 = vmatpush1.bf16.msra.mxu0 %v1889_v22  ;;  %v1923_v9 = vpack.c.bf16 %v1330_v8, %v1328_v7 }
 0x108   : > { %1892 = vmatprep.subr.bf16.mxu0 %v1891_v24  ;;  %1044 = vmatmul.mubr.f32.gmra.mrb[10].mxu1 %v702_v13 }
 0x109   : > { %1049 = vmatprep.mubr.f32.mxu1 %v705_v15  ;;  %1948 = vmatpush1.bf16.msra.mxu1 %v1885_v14 }
 0x10a   : > { %879 = vmatmul.mubr.f32.gmra.mrb[14].mxu0 %v706_v25  ;;  %1933 = vmatprep.subr.bf16.mxu1 %v1887_v16 }
 0x10b   : > { %1894 = vmatpush1.bf16.msra.mxu0 %v1893_v28 }
 0x10c   : > { %1050 = vmatmul.mubr.f32.gmra.mrb[12].mxu1 %v704_v21  ;;  %1896 = vmatprep.subr.bf16.mxu0 %v1895_v31 }
 0x10d   : > { %1055 = vmatprep.mubr.f32.mxu1 %v707_v23  ;;  %1949 = vmatpush1.bf16.msra.mxu1 %v1889_v22 }
 0x10e   : > { %1934 = vmatprep.subr.bf16.mxu1 %v1891_v24 }
 0x10f   : > { %1898 = vmatpush1.bf16.msra.mxu0 %v1897_v34 }
 0x110   : > { %1056 = vmatmul.mubr.f32.gmra.mrb[14].mxu1 %v706_v25  ;;  %1900 = vmatprep.subr.bf16.mxu0 %v1899_v37 }
 0x111   : > { %1950 = vmatpush1.bf16.msra.mxu1 %v1893_v28 }
 0x112   : > { %1935 = vmatprep.subr.bf16.mxu1 %v1895_v31 }
 0x113   : > { %1902 = vmatpush1.bf16.msra.mxu0 %v1901_v40 }
 0x114   : > { %1904 = vmatprep.subr.bf16.mxu0 %v1903_v43 }
 0x115   : > { %1951 = vmatpush1.bf16.msra.mxu1 %v1897_v34 }
 0x116   : > { %1936 = vmatprep.subr.bf16.mxu1 %v1899_v37 }
 0x117   : > { %1906 = vmatpush1.bf16.msra.mxu0 %v1905_v46 }
 0x118   : > { %1908 = vmatprep.subr.bf16.mxu0 %v1907_v49 }
 0x119   : > { %1952 = vmatpush1.bf16.msra.mxu1 %v1901_v40 }
 0x11a   : > { %1937 = vmatprep.subr.bf16.mxu1 %v1903_v43 }
 0x11b   : > { %1910 = vmatpush1.bf16.msra.mxu0 %v1909_v52 }
 0x11c   : > { %1912 = vmatprep.subr.bf16.mxu0 %v1911_v55 }
 0x11d   : > { %1953 = vmatpush1.bf16.msra.mxu1 %v1905_v46 }
 0x11e   : > { %1938 = vmatprep.subr.bf16.mxu1 %v1907_v49 }
 0x11f   : > { %1914 = vmatpush1.bf16.msra.mxu0 %v1913_v58 }
 0x120   : > { %1916 = vmatprep.subr.bf16.mxu0 %v1915_v61 }
 0x121   : > { %1954 = vmatpush1.bf16.msra.mxu1 %v1909_v52 }
 0x122   : > { %1939 = vmatprep.subr.bf16.mxu1 %v1911_v55 }
 0x123   : > { %1918 = vmatpush1.bf16.msra.mxu0 %v1917_v0 }
 0x124   : > { %1920 = vmatprep.subr.bf16.mxu0 %v1919_v3 }
 0x125   : > { %1955 = vmatpush1.bf16.msra.mxu1 %v1913_v58 }
 0x126   : > { %1940 = vmatprep.subr.bf16.mxu1 %v1915_v61 }
 0x127   : > { %1922 = vmatpush1.bf16.msra.mxu0 %v1921_v6 }
 0x128   : > { %1924 = vmatprep.subr.bf16.mxu0 %v1923_v9 }
 0x129   : > { %1956 = vmatpush1.bf16.msra.mxu1 %v1917_v0 }
 0x12a   : > { %1941 = vmatprep.subr.bf16.mxu1 %v1919_v3 }
 0x12b   : > { %1926 = vmatpush1.bf16.msra.mxu0 %v1925_v12 }
 0x12d   : > { %1957 = vmatpush1.bf16.msra.mxu1 %v1921_v6 }
 0x12e   : > { %1942 = vmatprep.subr.bf16.mxu1 %v1923_v9 }
 0x131   : > { %1958 = vmatpush1.bf16.msra.mxu1 %v1925_v12 }
 0x15c   : > { %v1085_v61 = vpop.xlane.xlu0 %1084 }
 0x1c1   : > { %v2983_v13 = vpop.f32.mrb[0].mxu0 }
 0x1c2   : > { %v1710_v14 = vmul.f32 -1.442695, %v2983_v13  ;;  %v2986_v15 = vpop.f32.mrb[1].mxu0 }
 0x1c3   : > { %v1711_v16 = vmul.f32 -1.442695, %v2986_v15 }
 0x1c4   : > { %2066 = vpow2.f32 %v1710_v14 }
 0x1c5   : > { %2068 = vpow2.f32 %v1711_v16  ;;  %v2989_v17 = vpop.f32.mrb[2].mxu0 }
 0x1c6   : > { %v1712_v18 = vmul.f32 -1.442695, %v2989_v17  ;;  %v2992_v19 = vpop.f32.mrb[3].mxu0 }
 0x1c7   : > { %v1713_v20 = vmul.f32 -1.442695, %v2992_v19  ;;  %v3001_v25 = vpop.f32.mrb[0].mxu1 }
 0x1c8   : > { %2070 = vpow2.f32 %v1712_v18  ;;  %v3003_v26 = vpop.f32.mrb[1].mxu1 }
 0x1c9   : > { %2072 = vpow2.f32 %v1713_v20  ;;  %v2995_v21 = vpop.f32.mrb[4].mxu0 }
 0x1ca   : > { %v1714_v22 = vmul.f32 -1.442695, %v2995_v21  ;;  %v2998_v23 = vpop.f32.mrb[5].mxu0 }
 0x1cb   : > { %v1715_v24 = vmul.f32 -1.442695, %v2998_v23  ;;  %v3011_v34 = vpop.f32.mrb[2].mxu1 }
 0x1cc   : > { %2074 = vpow2.f32 %v1714_v22  ;;  %v3013_v36 = vpop.f32.mrb[3].mxu1 }
 0x1cd   : > { %2076 = vpow2.f32 %v1715_v24  ;;  %v3005_v27 = vpop.f32.mrb[6].mxu0  ;;  %v3058_v24 = vpop.xlane.xlu0 %1096 }
 0x1ce   : > { %v2067_v28 = vpop.eup %2066  ;;  %v1716_v29 = vmul.f32 -1.442695, %v3005_v27  ;;  %v3008_v30 = vpop.f32.mrb[7].mxu0 }
 0x1cf   : > { %v2069_v31 = vpop.eup %2068  ;;  %v1155_v32 = vadd.f32 1.0, %v2067_v28  ;;  %v1717_v33 = vmul.f32 -1.442695, %v3008_v30  ;;  %v3021_v44 = vpop.f32.mrb[4].mxu1 }
 0x1d0   : > { %v1156_v35 = vadd.f32 1.0, %v2069_v31  ;;  %2078 = vpow2.f32 %v1716_v29  ;;  %v3023_v46 = vpop.f32.mrb[5].mxu1 }
 0x1d1   : > { %2080 = vrcp.f32 %v1155_v32  ;;  %v3015_v37 = vpop.f32.mrb[8].mxu0 }
 0x1d2   : > { %v2071_v38 = vpop.eup %2070  ;;  %2082 = vrcp.f32 %v1156_v35  ;;  %v1718_v39 = vmul.f32 -1.442695, %v3015_v37  ;;  %v3018_v40 = vpop.f32.mrb[9].mxu0 }
 0x1d3   : > { %v2073_v41 = vpop.eup %2072  ;;  %v1157_v42 = vadd.f32 1.0, %v2071_v38  ;;  %2084 = vpow2.f32 %v1717_v33  ;;  %v1719_v43 = vmul.f32 -1.442695, %v3018_v40  ;;  %v3031_v54 = vpop.f32.mrb[6].mxu1 }
 0x1d4   : > { %v1158_v45 = vadd.f32 1.0, %v2073_v41  ;;  %2086 = vpow2.f32 %v1718_v39  ;;  %v3033_v56 = vpop.f32.mrb[7].mxu1  ;;  %v1088_v38 = vpop.xlane.xlu1 %1087 }
 0x1d5   : > { %2088 = vrcp.f32 %v1157_v42  ;;  %v3025_v47 = vpop.f32.mrb[10].mxu0 }
 0x1d6   : > { %v2075_v48 = vpop.eup %2074  ;;  %2090 = vrcp.f32 %v1158_v45  ;;  %v1720_v49 = vmul.f32 -1.442695, %v3025_v47  ;;  %v3028_v50 = vpop.f32.mrb[11].mxu0 }
 0x1d7   : > { %v2077_v51 = vpop.eup %2076  ;;  %v1159_v52 = vadd.f32 1.0, %v2075_v48  ;;  %2092 = vpow2.f32 %v1719_v43  ;;  %v1721_v53 = vmul.f32 -1.442695, %v3028_v50  ;;  %v3041_v1 = vpop.f32.mrb[8].mxu1 }
 0x1d8   : > { %v1160_v55 = vadd.f32 1.0, %v2077_v51  ;;  %2094 = vpow2.f32 %v1720_v49  ;;  %v3044_v4 = vpop.f32.mrb[9].mxu1 }
 0x1d9   : > { %2096 = vrcp.f32 %v1159_v52  ;;  %v3035_v57 = vpop.f32.mrb[12].mxu0 }
 0x1da   : > { %v2079_v58 = vpop.eup %2078  ;;  %2098 = vrcp.f32 %v1160_v55  ;;  %v1722_v59 = vmul.f32 -1.442695, %v3035_v57  ;;  %v3038_v60 = vpop.f32.mrb[13].mxu0 }
 0x1db   : > { %v2081_v62 = vpop.eup %2080  ;;  %v1161_v63 = vadd.f32 1.0, %v2079_v58  ;;  %2100 = vpow2.f32 %v1721_v53  ;;  %v1723_v0 = vmul.f32 -1.442695, %v3038_v60  ;;  %v3055_v20 = vpop.f32.mrb[10].mxu1 }
 0x1dc   : > { %v2083_v2 = vpop.eup %2082  ;;  %v1203_v3 = vmul.f32 %v2081_v62, %v2983_v13  ;;  %2102 = vpow2.f32 %v1722_v59  ;;  %v3060_v28 = vpop.f32.mrb[11].mxu1 }
 0x1dd   : > { %v2085_v5 = vpop.eup %2084  ;;  %v1204_v6 = vmul.f32 %v2083_v2, %v2986_v15  ;;  %2104 = vrcp.f32 %v1161_v63  ;;  %v3047_v7 = vpop.f32.mrb[14].mxu0 }
 0x1de   : > { %v2087_v8 = vpop.eup %2086  ;;  %v1162_v9 = vadd.f32 1.0, %v2085_v5  ;;  %2106 = vpow2.f32 %v1723_v0  ;;  %v1219_v10 = vmul.f32 %v1203_v3, %v3001_v25  ;;  %v1724_v11 = vmul.f32 -1.442695, %v3047_v7  ;;  %v3051_v12 = vpop.f32.mrb[15].mxu0 }
 0x1df   : > { %v2089_v14 = vpop.eup %2088  ;;  %v1163_v13 = vadd.f32 1.0, %v2087_v8  ;;  %v1220_v16 = vmul.f32 %v1204_v6, %v3003_v26  ;;  %v1725_v18 = vmul.f32 -1.442695, %v3051_v12  ;;  %v3065_v42 = vpop.f32.mrb[12].mxu1 }
 0x1e0   : > { %v2091_v15 = vpop.eup %2090  ;;  %v1205_v22 = vmul.f32 %v2089_v14, %v2989_v17  ;;  %2108 = vrcp.f32 %v1162_v9  ;;  %v1235_v26 = vmul.f32 %v1219_v10, %v1085_v61  ;;  %v3068_v45 = vpop.f32.mrb[13].mxu1 }
 0x1e1   : > { %v2093_v25 = vpop.eup %2092  ;;  %v1206_v29 = vmul.f32 %v2091_v15, %v2992_v19  ;;  %2110 = vrcp.f32 %v1163_v13  ;;  %v1236_v31 = vmul.f32 %v1220_v16, %v1085_v61  ;;  %v1091_v55 = vpop.xlane.xlu0 %1090 }
 0x1e2   : > { %v2095_v32 = vpop.eup %2094  ;;  %v1164_v33 = vadd.f32 1.0, %v2093_v25  ;;  %2112 = vpow2.f32 %v1724_v11  ;;  %v1221_v35 = vmul.f32 %v1205_v22, %v3011_v34 }
 0x1e3   : > { %v2097_v39 = vpop.eup %2096  ;;  %v1165_v41 = vadd.f32 1.0, %v2095_v32  ;;  %2114 = vpow2.f32 %v1725_v18  ;;  %v1222_v17 = vmul.f32 %v1206_v29, %v3013_v36  ;;  %1395 = vmatprep.mubr.f32.mxu0 %v1236_v31 }
 0x1e4   : > { %v2099_v43 = vpop.eup %2098  ;;  %v1207_v19 = vmul.f32 %v2097_v39, %v2995_v21  ;;  %2116 = vrcp.f32 %v1164_v33  ;;  %1396 = vmatmul.mubr.f32.vlgmr.msra.gmra.mrb[16].mxu0 %v1235_v26  ;;  %v1237_v53 = vmul.f32 %v1221_v35, %v1088_v38  ;;  %v1057_v21 = vpop.f32.mrb[14].mxu1 }
 0x1e5   : > { %v2101_v48 = vpop.eup %2100  ;;  %v1208_v49 = vmul.f32 %v2099_v43, %v2998_v23  ;;  %2118 = vrcp.f32 %v1165_v41  ;;  %v1238_v34 = vmul.f32 %v1222_v17, %v1088_v38  ;;  %v1059_v23 = vpop.f32.mrb[15].mxu1 }
 0x1e6   : > { %v2103_v51 = vpop.eup %2102  ;;  %v1166_v52 = vadd.f32 1.0, %v2101_v48  ;;  %v1223_v36 = vmul.f32 %v1207_v19, %v3021_v44  ;;  %v1094_v10 = vpop.xlane.xlu0 %1093 }
 0x1e7   : > { %v2105_v58 = vpop.eup %2104  ;;  %v1167_v59 = vadd.f32 1.0, %v2103_v51  ;;  %v1224_v61 = vmul.f32 %v1208_v49, %v3023_v46  ;;  %1401 = vmatprep.mubr.f32.mxu0 %v1238_v34  ;;  %v1252_v51 = vld [vmem:[#allocation2 + $0x8] sm:$0xff] }
 0x1e8   : > { %v2107_v62 = vpop.eup %2106  ;;  %v1209_v63 = vmul.f32 %v2105_v58, %v3005_v27  ;;  %2120 = vrcp.f32 %v1166_v52  ;;  %1402 = vmatmul.mubr.f32.gmra.mrb[18].mxu0 %v1237_v53  ;;  %v1239_v5 = vmul.f32 %v1223_v36, %v1091_v55  ;;  %v1254_v58 = vld [vmem:[#allocation2 + $0x18] sm:$0xff] }
 0x1e9   : > { %2122 = vrcp.f32 %v1167_v59  ;;  %v1168_v0 = vadd.f32 1.0, %v2107_v62  ;;  %v1240_v2 = vmul.f32 %v1224_v61, %v1091_v55  ;;  %v1253_v55 = vld [vmem:[#allocation2 + $0x10] sm:$0xff]  ;;  %v1255_v62 = vld [vmem:[#allocation2 + $0x20] sm:$0xff] }
 0x1ea   : > { %v2109_v3 = vpop.eup %2108  ;;  %v1225_v44 = vmul.f32 %v1209_v63, %v3031_v54  ;;  %v1256_v63 = vld [vmem:[#allocation2 + $0x28] sm:$0xff] }
 0x1eb   : > { %v2111_v6 = vpop.eup %2110  ;;  %v1210_v8 = vmul.f32 %v2109_v3, %v3008_v30  ;;  %2124 = vrcp.f32 %v1168_v0  ;;  %1407 = vmatprep.mubr.f32.mxu0 %v1240_v2 }
 0x1ec   : > { %v2113_v46 = vpop.eup %2112  ;;  %v1211_v9 = vmul.f32 %v2111_v6, %v3015_v37  ;;  %1408 = vmatmul.mubr.f32.gmra.mrb[20].mxu0 %v1239_v5  ;;  %v1241_v25 = vmul.f32 %v1225_v44, %v1094_v10  ;;  %v1100_v37 = vpop.xlane.xlu1 %1099  ;;  %v1257_v5 = vld [vmem:[#allocation2 + $0x30] sm:$0xff]  ;;  %v1258_v44 = vld [vmem:[#allocation2 + $0x38] sm:$0xff] }
 0x1ed   : > { %v2115_v27 = vpop.eup %2114  ;;  %v1169_v11 = vadd.f32 1.0, %v2113_v46  ;;  %v1226_v14 = vmul.f32 %v1210_v8, %v3033_v56 }
 0x1ee   : > { %v2117_v13 = vpop.eup %2116  ;;  %v1170_v16 = vadd.f32 1.0, %v2115_v27  ;;  %v1227_v18 = vmul.f32 %v1211_v9, %v3041_v1  ;;  %v1260_v27 = vld [vmem:[#allocation2 + $0x48] sm:$0xff] }
 0x1ef   : > { %v2119_v15 = vpop.eup %2118  ;;  %v1212_v54 = vmul.f32 %v2117_v13, %v3018_v40  ;;  %2126 = vrcp.f32 %v1169_v11  ;;  %v1242_v30 = vmul.f32 %v1226_v14, %v1094_v10  ;;  %v1259_v10 = vld [vmem:[#allocation2 + $0x40] sm:$0xff] }
 0x1f0   : > { %v1213_v22 = vmul.f32 %v2119_v15, %v3025_v47  ;;  %2128 = vrcp.f32 %v1170_v16  ;;  %v1243_v26 = vmul.f32 %v1227_v18, %v3058_v24  ;;  %v1261_v18 = vld [vmem:[#allocation2 + $0x50] sm:$0xff]  ;;  %v1262_v15 = vld [vmem:[#allocation2 + $0x58] sm:$0xff] }
 0x1f1   : > { %v1228_v29 = vmul.f32 %v1212_v54, %v3044_v4  ;;  %1413 = vmatprep.mubr.f32.mxu0 %v1242_v30 }
 0x1f2   : > { %v2121_v31 = vpop.eup %2120  ;;  %v1229_v56 = vmul.f32 %v1213_v22, %v3055_v20  ;;  %1414 = vmatmul.mubr.f32.gmra.mrb[22].mxu0 %v1241_v25  ;;  %v1103_v20 = vpop.xlane.xlu1 %1102 }
 0x1f3   : > { %v2123_v32 = vpop.eup %2122  ;;  %v1214_v1 = vmul.f32 %v2121_v31, %v3028_v50  ;;  %v1244_v33 = vmul.f32 %v1228_v29, %v3058_v24  ;;  %v1264_v29 = vld [vmem:[#allocation2 + $0x68] sm:$0xff] }
 0x1f4   : > { %v1215_v40 = vmul.f32 %v2123_v32, %v3035_v57  ;;  %v1245_v41 = vmul.f32 %v1229_v56, %v1100_v37 }
 0x1f5   : > { %v2125_v47 = vpop.eup %2124  ;;  %v1230_v35 = vmul.f32 %v1214_v1, %v3060_v28  ;;  %1419 = vmatprep.mubr.f32.mxu1 %v1244_v33  ;;  %v1265_v33 = vld [vmem:[#allocation2 + $0x70] sm:$0xff] }
 0x1f6   : > { %v1216_v4 = vmul.f32 %v2125_v47, %v3038_v60  ;;  %v1231_v38 = vmul.f32 %v1215_v40, %v3065_v42  ;;  %1420 = vmatmul.mubr.f32.vlgmr.msra.gmra.mrb[16].mxu1 %v1243_v26  ;;  %v1106_v60 = vpop.xlane.xlu1 %1105  ;;  %v1266_v40 = vld [vmem:[#allocation2 + $0x78] sm:$0xff] }
 0x1f7   : > { %v1246_v39 = vmul.f32 %v1230_v35, %v1100_v37  ;;  %v1263_v37 = vld [vmem:[#allocation2 + $0x60] sm:$0xff] }
 0x1f8   : > { %v1232_v50 = vmul.f32 %v1216_v4, %v3068_v45  ;;  %v1247_v19 = vmul.f32 %v1231_v38, %v1103_v20  ;;  %v1251_v45 = vld [vmem:[#allocation2] sm:$0xff] }
 0x1f9   : > { %v2127_v17 = vpop.eup %2126  ;;  %1425 = vmatprep.mubr.f32.mxu1 %v1246_v39 }
 0x1fa   : > { %v2129_v43 = vpop.eup %2128  ;;  %v1217_v57 = vmul.f32 %v2127_v17, %v3047_v7  ;;  %v1248_v24 = vmul.f32 %v1232_v50, %v1103_v20  ;;  %1426 = vmatmul.mubr.f32.gmra.mrb[18].mxu1 %v1245_v41 }
 0x1fb   : > { %v1218_v28 = vmul.f32 %v2129_v43, %v3051_v12 }
 0x1fc   : > { %v1233_v48 = vmul.f32 %v1217_v57, %v1057_v21  ;;  %1431 = vmatprep.mubr.f32.mxu1 %v1248_v24 }
 0x1fd   : > { %v1234_v42 = vmul.f32 %v1218_v28, %v1059_v23 }
 0x1fe   : > { %1432 = vmatmul.mubr.f32.gmra.mrb[20].mxu1 %v1247_v19  ;;  %v1249_v34 = vmul.f32 %v1233_v48, %v1106_v60 }
 0x1ff   : > { %v1250_v49 = vmul.f32 %v1234_v42, %v1106_v60 }
 0x201   : > { %1437 = vmatprep.mubr.f32.mxu1 %v1250_v49 }
 0x202   : > { %1438 = vmatmul.mubr.f32.gmra.mrb[22].mxu1 %v1249_v34 }
 0x2b7   : > { %v1397_v52 = vpop.f32.mrb[16].mxu0 }
 0x2b8   : > { %v1444_v53 = vadd.f32 %v1397_v52, %v1251_v45  ;;  %v1399_v36 = vpop.f32.mrb[17].mxu0 }
 0x2b9   : > { %v1445_v7 = vadd.f32 %v1399_v36, %v1252_v51 }
 0x2ba   : > { %1460 = vst [vmem:[#allocation2] sm:$0xff] %v1444_v53 }
 0x2bb   : > { %1461 = vst [vmem:[#allocation2 + $0x8] sm:$0xff] %v1445_v7  ;;  %v1403_v12 = vpop.f32.mrb[18].mxu0 }
 0x2bc   : > { %v1446_v59 = vadd.f32 %v1403_v12, %v1253_v55  ;;  %v1405_v61 = vpop.f32.mrb[19].mxu0 }
 0x2bd   : > { %v1447_v21 = vadd.f32 %v1405_v61, %v1254_v58 }
 0x2be   : > { %1462 = vst [vmem:[#allocation2 + $0x10] sm:$0xff] %v1446_v59 }
 0x2bf   : > { %1463 = vst [vmem:[#allocation2 + $0x18] sm:$0xff] %v1447_v21  ;;  %v1409_v23 = vpop.f32.mrb[20].mxu0 }
 0x2c0   : > { %v1448_v0 = vadd.f32 %v1409_v23, %v1255_v62  ;;  %v1411_v2 = vpop.f32.mrb[21].mxu0 }
 0x2c1   : > { %v1449_v3 = vadd.f32 %v1411_v2, %v1256_v63 }
 0x2c2   : > { %1464 = vst [vmem:[#allocation2 + $0x20] sm:$0xff] %v1448_v0 }
 0x2c3   : > { %1465 = vst [vmem:[#allocation2 + $0x28] sm:$0xff] %v1449_v3 }
 0x2c5   : > { %v1415_v6 = vpop.f32.mrb[22].mxu0 }
 0x2c6   : > { %v1450_v8 = vadd.f32 %v1415_v6, %v1257_v5  ;;  %v1417_v46 = vpop.f32.mrb[23].mxu0 }
 0x2c7   : > { %v1451_v9 = vadd.f32 %v1417_v46, %v1258_v44 }
 0x2c8   : > { %1466 = vst [vmem:[#allocation2 + $0x30] sm:$0xff] %v1450_v8 }
 0x2c9   : > { %1467 = vst [vmem:[#allocation2 + $0x38] sm:$0xff] %v1451_v9  ;;  %v1421_v11 = vpop.f32.mrb[16].mxu1 }
 0x2ca   : > { %v1452_v14 = vadd.f32 %v1421_v11, %v1259_v10  ;;  %v1423_v13 = vpop.f32.mrb[17].mxu1 }
 0x2cb   : > { %v1453_v16 = vadd.f32 %v1423_v13, %v1260_v27 }
 0x2cc   : > { %1468 = vst [vmem:[#allocation2 + $0x40] sm:$0xff] %v1452_v14 }
 0x2cd   : > { %1469 = vst [vmem:[#allocation2 + $0x48] sm:$0xff] %v1453_v16  ;;  %v1427_v54 = vpop.f32.mrb[18].mxu1 }
 0x2ce   : > { %v1454_v30 = vadd.f32 %v1427_v54, %v1261_v18  ;;  %v1429_v22 = vpop.f32.mrb[19].mxu1 }
 0x2cf   : > { %v1455_v25 = vadd.f32 %v1429_v22, %v1262_v15 }
 0x2d0   : > { %1470 = vst [vmem:[#allocation2 + $0x50] sm:$0xff] %v1454_v30 }
 0x2d1   : > { %1471 = vst [vmem:[#allocation2 + $0x58] sm:$0xff] %v1455_v25  ;;  %v1433_v31 = vpop.f32.mrb[20].mxu1 }
 0x2d2   : > { %v1456_v56 = vadd.f32 %v1433_v31, %v1263_v37  ;;  %v1435_v32 = vpop.f32.mrb[21].mxu1 }
 0x2d3   : > { %v1457_v1 = vadd.f32 %v1435_v32, %v1264_v29 }
 0x2d4   : > { %1472 = vst [vmem:[#allocation2 + $0x60] sm:$0xff] %v1456_v56 }
 0x2d5   : > { %1473 = vst [vmem:[#allocation2 + $0x68] sm:$0xff] %v1457_v1  ;;  %v1439_v26 = vpop.f32.mrb[22].mxu1 }
 0x2d6   : > { %v1458_v47 = vadd.f32 %v1439_v26, %v1265_v33  ;;  %v1441_v35 = vpop.f32.mrb[23].mxu1 }
 0x2d7   : > { %v1459_v4 = vadd.f32 %v1441_v35, %v1266_v40 }
 0x2d8   : > { %1474 = vst [vmem:[#allocation2 + $0x70] sm:$0xff] %v1458_v47 }
 0x2d9   : > { %1475 = vst [vmem:[#allocation2 + $0x78] sm:$0xff] %v1459_v4 }
 0x2da PF: > { %p1476_p3 = scmp.eq.s32.totalorder %s2250_s7, 3  ;;  %p1477_p5 = scmp.eq.s32.totalorder %s2246_s30, 1 }
 0x2dc   : > { %p1478_p6 = pnand %p1477_p5, %p1476_p3 }
 0x2dd   : > { %v1482_v38 = vld [vmem:[#allocation2] sm:$0xff] (!%p1478_p6)  ;;  %v1483_v20 = vld [vmem:[#allocation2 + $0x8] sm:$0xff] (!%p1478_p6)  ;;  %v1484_v39 = vld [vmem:[#allocation2 + $0x10] sm:$0xff] (!%p1478_p6) }
 0x2de   : > { %1481 = sbr.rel (%p1478_p6) target bundleno = 742 (0x2e6), region = 98  ;;  %1498 = vst [vmem:[%s2733_s20] sm:$0xff] (!%p1478_p6), %v1482_v38  ;;  %1499 = vst [vmem:[%s2733_s20 + $0x8] sm:$0xff] (!%p1478_p6), %v1483_v20  ;;  %v1485_v41 = vld [vmem:[#allocation2 + $0x18] sm:$0xff] (!%p1478_p6)  ;;  %v1486_v50 = vld [vmem:[#allocation2 + $0x20] sm:$0xff] (!%p1478_p6) }
 0x2df   : > { %1500 = vst [vmem:[%s2733_s20 + $0x10] sm:$0xff] (!%p1478_p6), %v1484_v39  ;;  %v1487_v17 = vld [vmem:[#allocation2 + $0x28] sm:$0xff] (!%p1478_p6)  ;;  %1501 = vst [vmem:[%s2733_s20 + $0x18] sm:$0xff] (!%p1478_p6), %v1485_v41  ;;  %v1488_v43 = vld [vmem:[#allocation2 + $0x30] sm:$0xff] (!%p1478_p6) }
 0x2e0   : > { %1502 = vst [vmem:[%s2733_s20 + $0x20] sm:$0xff] (!%p1478_p6), %v1486_v50  ;;  %1503 = vst [vmem:[%s2733_s20 + $0x28] sm:$0xff] (!%p1478_p6), %v1487_v17  ;;  %v1489_v57 = vld [vmem:[#allocation2 + $0x38] sm:$0xff] (!%p1478_p6)  ;;  %v1490_v24 = vld [vmem:[#allocation2 + $0x40] sm:$0xff] (!%p1478_p6) }
 0x2e1   : > { %1504 = vst [vmem:[%s2733_s20 + $0x30] sm:$0xff] (!%p1478_p6), %v1488_v43  ;;  %1505 = vst [vmem:[%s2733_s20 + $0x38] sm:$0xff] (!%p1478_p6), %v1489_v57  ;;  %v1491_v28 = vld [vmem:[#allocation2 + $0x48] sm:$0xff] (!%p1478_p6)  ;;  %v1492_v19 = vld [vmem:[#allocation2 + $0x50] sm:$0xff] (!%p1478_p6) }
 0x2e2   : > { %1506 = vst [vmem:[%s2733_s20 + $0x40] sm:$0xff] (!%p1478_p6), %v1490_v24  ;;  %v1493_v48 = vld [vmem:[#allocation2 + $0x58] sm:$0xff] (!%p1478_p6)  ;;  %1507 = vst [vmem:[%s2733_s20 + $0x48] sm:$0xff] (!%p1478_p6), %v1491_v28  ;;  %v1494_v60 = vld [vmem:[#allocation2 + $0x60] sm:$0xff] (!%p1478_p6) }
 0x2e3   : > { %1508 = vst [vmem:[%s2733_s20 + $0x50] sm:$0xff] (!%p1478_p6), %v1492_v19  ;;  %1509 = vst [vmem:[%s2733_s20 + $0x58] sm:$0xff] (!%p1478_p6), %v1493_v48  ;;  %v1495_v42 = vld [vmem:[#allocation2 + $0x68] sm:$0xff] (!%p1478_p6)  ;;  %v1496_v49 = vld [vmem:[#allocation2 + $0x70] sm:$0xff] (!%p1478_p6) }
 0x2e4   : > { %1510 = vst [vmem:[%s2733_s20 + $0x60] sm:$0xff] (!%p1478_p6), %v1494_v60  ;;  %1511 = vst [vmem:[%s2733_s20 + $0x68] sm:$0xff] (!%p1478_p6), %v1495_v42  ;;  %v1497_v34 = vld [vmem:[#allocation2 + $0x78] sm:$0xff] (!%p1478_p6) }
 0x2e5   : > { %1512 = vst [vmem:[%s2733_s20 + $0x70] sm:$0xff] %v1496_v49  ;;  %1513 = vst [vmem:[%s2733_s20 + $0x78] sm:$0xff] %v1497_v34 }
 0x2e6 PF: > { %s1734_s6 = sshll.u32 %s2254_s8, 11  ;;  %s3221_s21 = sld [smem:[#allocation22_spill]] }
 0x2e7   : > { %s1529_s19 = sshll.u32 %s2733_s20, 4  ;;  %s3222_s14 = sand.u32 1, %s2230_s27   ;;  %s3118_s19 = int_to_ptr.vmem [resolvable:$true] %s1529_s19 }
 0x2e8   : > { %s3122_s23 = scalar_lea.sflag [#allocation8], %s3222_s14  ;;  %s2142_s16 = scalar_lea.vmem %s3118_s19, 2048 }
 0x2e9   : > { %p2143_p7 = scmp.ne.s32.totalorder %s3118_s19, %s2142_s16  ;;  %s2274_s8 = smov [#allocation7]  }
 0x2ea   : > { %s2146_s28 = sshll.u32 %s2274_s8, 4  ;;  %s2147_s28 = int_to_ptr.vmem [resolvable:$false] %s2146_s28 }
 0x2eb   : > { %p2144_p8 = pnand %p2143_p7, %p2401_p0  ;;  %s2148_s2 = scalar_lea.vmem %s2147_s28, 4096 }
 0x2ec   : > { %s3115_s18 = scalar_lea.hbm %s3221_s21, %s1734_s6  ;;  %p2149_p10 = scmp.lt.s32.totalorder %s3118_s19, %s2147_s28 }
 0x2ed   : > { %p2145_p9 = pneg %p2144_p8  ;;  %p2150_p11 = scmp.lt.s32.totalorder %s2148_s2, %s2142_s16 }
 0x2ef   : > { %p2151_p12 = por %p2150_p11, %p2149_p10 }
 0x2f1   : > { %p2152_p13 = pnand %p2151_p12, %p2145_p9 }
 0x2f3   : > { %2155 = shalt.err (!%p2152_p13)
}
 0x2f4   : > { %s2156_s17 = scalar_lea.hbm %s3115_s18, 2048  ;;  %s2160_s20 = scalar_lea.hbm %s3221_s21, 4096 }
 0x2f5   : > { %p2157_p1 = scmp.ne.s32.totalorder %s3115_s18, %s2156_s17  ;;  %p2161_p5 = scmp.lt.u32.totalorder %s3115_s18, %s3221_s21 }
 0x2f6   : > { %p2162_p6 = scmp.lt.u32.totalorder %s2160_s20, %s2156_s17  ;;  %p2164_p8 = scmp.lt.u32.totalorder %s2156_s17, %s3115_s18 }
 0x2f7   : > { %p2158_p2 = pnand %p2157_p1, %p2401_p0 }
 0x2f8   : > { %p2163_p7 = por %p2162_p6, %p2161_p5 }
 0x2f9   : > { %p2159_p3 = pneg %p2158_p2 }
 0x2fa   : > { %p2165_p9 = por %p2164_p8, %p2163_p7 }
 0x2fc   : > { %p2166_p10 = pnand %p2165_p9, %p2159_p3 }
 0x2fe   : > { %2169 = shalt.err (!%p2166_p10)
}
 0x2ff   : > { %s2275_s9 = smov 256   ;;  %s2276_s10 = smov 16  }
 0x300   : > { %1959 = dma.vmem_to_hbm [thread:$0]  (%p2401_p0), %s3118_s19, 2048, %s3115_s18, %s3122_s23, %s2275_s9, %s2275_s9, %s2276_s10  }
 0x301 PF: > { %p1965_p11 = scmp.ge.s32.totalorder %s2270_s12, 2  ;;  %s1544_s25 = sand.u32 1, %s2226_s26  }
 0x302   : > { %s1545_s11 = scalar_lea.sflag [#allocation8], %s1544_s25 }
 0x303   : > { %p1962_p12 = pnand %p1965_p11, %p2417_p4 }
 0x305   : > { %2221 = dma.done.wait (!%p1962_p12), %s1545_s11, 2048  }
 0x306   : > { %2223 = vsyncadd (!%p1962_p12), %s1545_s11, 4294965248  ;;  %s25_s12 = sadd.s32 1, %s2270_s12   ;;  %s3223_s6 = sld [smem:[#allocation19_spill]] }
 0x307   : > { %p22_p13 = scmp.ge.s32.totalorder %s25_s12, 18   ;;  %s3224_s28 = sld [smem:[#allocation11_spill]] }
 0x308   : > { %s3225_s29 = sld [smem:[#allocation18_spill]]  ;;  %s3226_s30 = sld [smem:[#allocation12_spill]] }
 0x309   : > { %s3227_s7 = sld [smem:[#allocation13_spill]]  ;;  %s3228_s8 = sld [smem:[#allocation14_spill]] }
 0x30a   : > { %s3229_s9 = sld [smem:[#allocation15_spill]]  ;;  %s3230_s10 = sld [smem:[#allocation16_spill]] }
 0x30b   : > { %s3231_s11 = sld [smem:[#allocation17_spill]]  ;;  %s3232_s26 = smov %s2230_s27 }
 0x30c   : > { %s3233_s27 = smov %s2234_s0  ;;  %s3234_s0 = smov %s3223_s6 }
 0x30d   :  { %24 = sbr.rel (!%p22_p13) target bundleno = 23 (0x17), region = 155 }
 0x314   :  { %1550 = vsyncpa [#allocation8], 1 }
 0x315   :  { %1552 = vsyncpa [#allocation8 + $0x1], 1 }

</bundles_post_ra>
